<compile_context>
chip_gen: v7x
topology: tpu7x:2x2x1
jax: 0.10.0
libtpu: 0.0.40
codegen_flags: <defaults>
</compile_context>

<pallas_src>
import jax
import jax.numpy as jnp
from jax.experimental import pallas as pl
from jax.experimental.pallas import tpu as pltpu

# ---------------- network configuration (layers = [3, H, H, 1]) --------------
HIDDEN = 32
LAYERS = [3, HIDDEN, HIDDEN, 1]


def _g0(x1, x2, t):
    # TODO(synk): g0 is an arbitrary user-supplied callable in train_dict;
    # deterministic analytic stand-in used here.
    return jnp.sin(x1) * jnp.cos(x2) * t


def pinn_kernel(scal_ref, x_ref, lb2_ref, ub2_ref,
                w0_ref, b0_ref, w1_ref, b1_ref, w2_ref, out_ref):
    # scal_ref (SMEM, f32[1]): [b2]
    # x_ref: (3, T) feature-major raw coords; rows = (x1, x2, t), cols = lanes.
    # lb2_ref / ub2_ref: (2, 1) columns [lb0; lb1] / [ub0; ub1].
    # w0_ref: (H, 3) coord-shift-folded; b0_ref/b1_ref: (H, 1); w1_ref: (H, H);
    # w2_ref: (1, H).
    x = x_ref[...]                                # (3, T)
    x1 = x[0:1, :]                                # (1, T)
    x2 = x[1:2, :]                                # (1, T)
    t = x[2:3, :]                                 # (1, T)

    # Layer 0 (3 -> H): coord shift already folded into w0/b0; tiny K=3 dot
    # rides the otherwise-idle MXU instead of burning VALU slots.
    h = jnp.tanh(jnp.dot(w0_ref[...], x, preferred_element_type=jnp.float32)
                 + b0_ref[...])                   # (H, T)

    # Layer 1 (H -> H): dense MXU matmul, batch is the wide output dimension.
    h = jnp.tanh(jnp.dot(w1_ref[...], h, preferred_element_type=jnp.float32)
                 + b1_ref[...])                   # (H, T)

    # Layer 2 (H -> 1): (1,H) x (H,T) on the MXU + scalar output bias (SMEM).
    y = jnp.dot(w2_ref[...], h, preferred_element_type=jnp.float32) + scal_ref[0]

    # g(x1, x2, t) mask: two-row form to cut the 1/8-sublane-occupancy tax.
    x12 = x[0:2, :]                               # (2, T)
    d = (x12 - lb2_ref[...]) * (x12 - ub2_ref[...])   # (2, T): rows are
    g = d[0:1, :] * d[1:2, :] * t                 # (x1-lb0)(x1-ub0), (x2-lb1)(x2-ub1)

    out_ref[...] = g * y + _g0(x1, x2, t)         # (1, T), lane-dense store


def _pick_tile(n, *, max_tile=8192):
    """Lane-aligned batch tile; >= 2 grid blocks so v7x's 2 TCs both get work."""
    half = -(-n // 2)
    tile = -(-half // 128) * 128
    return max(128, min(max_tile, tile))


def pinn_forward(x1, x2, t, lb, ub, params, *, tile=None):
    """x1, x2, t: (N, 1) float32. lb, ub: (1, 3). Returns psi: (N, 1) float32."""
    assert len(params) == 3, "kernel hardcodes layers = [3, H, H, 1]"
    (w0, b0), (w1, b1), (w2, b2) = params
    N = x1.shape[0]
    H = w0.shape[1]

    if tile is None:
        tile = _pick_tile(N)
    tile = max(128, (int(tile) // 128) * 128)
    n_blocks = -(-N // tile)
    N_pad = n_blocks * tile

    # Feature-major input (3, N_pad) built in one stack + pad pass.
    Xf = jnp.stack([x1.reshape(-1), x2.reshape(-1), t.reshape(-1)],
                   axis=0).astype(jnp.float32)                      # (3, N)
    Xf = jnp.pad(Xf, ((0, 0), (0, N_pad - N)))                      # (3, N_pad)

    # Fold coord shift Xs = X*scale + offset into layer-0 weights/bias.
    # (Note: divides by zero if any ub == lb — same hazard as the reference.)
    scale = (2.0 / (ub - lb)).reshape(3).astype(jnp.float32)        # (3,)
    offset = (-2.0 * lb / (ub - lb) - 1.0).reshape(3).astype(jnp.float32)
    w0p = (w0.T * scale[None, :]).astype(jnp.float32)               # (H, 3)
    b0p = (b0.T + w0.T @ offset.reshape(3, 1)).astype(jnp.float32)  # (H, 1)

    # Remaining feature-major weights / biases.
    w1f, b1f = w1.T.astype(jnp.float32), b1.T.astype(jnp.float32)   # (H, H), (H, 1)
    w2f = w2.T.astype(jnp.float32)                                  # (1, H)

    # Boundary columns for the g mask and the scalar output bias.
    lb2 = jnp.array([[lb[0, 0]], [lb[0, 1]]], dtype=jnp.float32)    # (2, 1)
    ub2 = jnp.array([[ub[0, 0]], [ub[0, 1]]], dtype=jnp.float32)    # (2, 1)
    scal = b2.reshape(-1).astype(jnp.float32)                       # (1,)

    full = lambda shape: pl.BlockSpec(shape, lambda i: (0, 0))

    cost = pl.CostEstimate(
        flops=int((2 * 3 * H + 2 * H * H + 2 * H + 32) * N_pad),
        transcendentals=int((2 * H + 2) * N_pad),
        bytes_accessed=int(16 * N_pad),
    )

    out = pl.pallas_call(
        pinn_kernel,
        out_shape=jax.ShapeDtypeStruct((1, N_pad), jnp.float32),
        grid_spec=pltpu.PrefetchScalarGridSpec(
            num_scalar_prefetch=0,
            grid=(n_blocks,),
            in_specs=[
                pl.BlockSpec(memory_space=pltpu.MemorySpace.SMEM),  # [b2]
                pl.BlockSpec((3, tile), lambda i: (0, i)),          # X feature-major
                full((2, 1)),                                       # lb column
                full((2, 1)),                                       # ub column
                full((H, 3)),                                       # W0' (shift-folded)
                full((H, 1)),                                       # b0'
                full((H, H)),                                       # W1^T
                full((H, 1)),                                       # b1^T
                full((1, H)),                                       # W2^T (row)
            ],
            out_specs=pl.BlockSpec((1, tile), lambda i: (0, i)),    # lane-dense psi
        ),
        compiler_params=pltpu.CompilerParams(
            dimension_semantics=("parallel",)),
        cost_estimate=cost,
    )(scal, Xf, lb2, ub2, w0p, b0p, w1f, b1f, w2f)

    return out[:, :N].T                    # (N, 1)


def init_params(key, layers):
    """Xavier-normal weights, zero biases (matches PINN.initialize_NN)."""
    params = []
    for l in range(len(layers) - 1):
        key, sub = jax.random.split(key)
        fan_in, fan_out = layers[l], layers[l + 1]
        std = jnp.sqrt(2.0 / (fan_in + fan_out))
        W = std * jax.random.normal(sub, (fan_in, fan_out), dtype=jnp.float32)
        b = jnp.zeros((1, fan_out), dtype=jnp.float32)
        params.append((W, b))
    return params


def pinn_forward_ref(x1, x2, t, lb, ub, params):
    """Pure-JAX reference (batch-major) for correctness checking."""
    X = jnp.concatenate([x1, x2, t], axis=1)
    Xs = 2.0 * (X - lb) / (ub - lb) - 1.0
    (w0, b0), (w1, b1), (w2, b2) = params
    h = jnp.tanh(Xs @ w0 + b0)
    h = jnp.tanh(h @ w1 + b1)
    y = h @ w2 + b2
    g = (x1 - lb[0, 0]) * (x1 - ub[0, 0]) * (x2 - lb[0, 1]) * (x2 - ub[0, 1]) * t
    return g * y + _g0(x1, x2, t)


if __name__ == "__main__":
    key = jax.random.PRNGKey(0)
    k_p, k1, k2, k3 = jax.random.split(key, 4)

    N = 2000  # ragged on purpose; wrapper pads to 2048 -> 2 grid steps of 1024
    lb = jnp.array([[0.0, 0.0, 0.0]], dtype=jnp.float32)   # (x1, x2, t) lower bounds
    ub = jnp.array([[1.0, 1.0, 1.0]], dtype=jnp.float32)   # (x1, x2, t) upper bounds

    x1 = jax.random.uniform(k1, (N, 1), dtype=jnp.float32)
    x2 = jax.random.uniform(k2, (N, 1), dtype=jnp.float32)
    t = jax.random.uniform(k3, (N, 1), dtype=jnp.float32)

    params = init_params(k_p, LAYERS)

    psi = pinn_forward(x1, x2, t, lb, ub, params)
    jax.block_until_ready(psi)

    psi_ref = pinn_forward_ref(x1, x2, t, lb, ub, params)
    assert psi.shape == (N, 1)
    err = float(jnp.max(jnp.abs(psi - psi_ref)))
    assert err < 5e-5, f"max abs error {err}"

    print("KERNEL_OK")
</pallas_src>

<mosaic_0001>
module attributes {stable_mosaic.version = 11 : i64} {
  func.func @pinn_kernel(%arg0: i32, %arg1: memref<1xf32, #tpu.memory_space<smem>>, %arg2: memref<3x1024xf32, #tpu.memory_space<vmem>>, %arg3: memref<2x1xf32, #tpu.memory_space<vmem>>, %arg4: memref<2x1xf32, #tpu.memory_space<vmem>>, %arg5: memref<32x3xf32, #tpu.memory_space<vmem>>, %arg6: memref<32x1xf32, #tpu.memory_space<vmem>>, %arg7: memref<32x32xf32, #tpu.memory_space<vmem>>, %arg8: memref<32x1xf32, #tpu.memory_space<vmem>>, %arg9: memref<1x32xf32, #tpu.memory_space<vmem>>, %arg10: memref<1x1024xf32, #tpu.memory_space<vmem>>) attributes {dimension_semantics = [#tpu.dimension_semantics<parallel>], iteration_bounds = array<i64: 2>, scalar_prefetch = 0 : i64, scratch_operands = 0 : i64, tpu.core_type = #tpu.core_type<tc>, window_params = [{transform_indices = @transform_0, window_bounds = array<i64: 1>}, {transform_indices = @transform_1, window_bounds = array<i64: 3, 1024>}, {pipeline_mode = #tpu.pipeline_mode<synchronous>, transform_indices = @transform_2, window_bounds = array<i64: 2, 1>}, {pipeline_mode = #tpu.pipeline_mode<synchronous>, transform_indices = @transform_3, window_bounds = array<i64: 2, 1>}, {pipeline_mode = #tpu.pipeline_mode<synchronous>, transform_indices = @transform_4, window_bounds = array<i64: 32, 3>}, {pipeline_mode = #tpu.pipeline_mode<synchronous>, transform_indices = @transform_5, window_bounds = array<i64: 32, 1>}, {pipeline_mode = #tpu.pipeline_mode<synchronous>, transform_indices = @transform_6, window_bounds = array<i64: 32, 32>}, {pipeline_mode = #tpu.pipeline_mode<synchronous>, transform_indices = @transform_7, window_bounds = array<i64: 32, 1>}, {pipeline_mode = #tpu.pipeline_mode<synchronous>, transform_indices = @transform_8, window_bounds = array<i64: 1, 32>}, {transform_indices = @transform_9, window_bounds = array<i64: 1, 1024>}]} {
    %c0 = arith.constant 0 : index
    %c0_0 = arith.constant 0 : index
    %0 = vector.load %arg2[%c0, %c0_0] : memref<3x1024xf32, #tpu.memory_space<vmem>>, vector<3x1024xf32>
    %1 = vector.extract_strided_slice %0 {offsets = [0, 0], sizes = [1, 1024], strides = [1, 1]} : vector<3x1024xf32> to vector<1x1024xf32>
    %2 = vector.extract_strided_slice %0 {offsets = [1, 0], sizes = [1, 1024], strides = [1, 1]} : vector<3x1024xf32> to vector<1x1024xf32>
    %3 = vector.extract_strided_slice %0 {offsets = [2, 0], sizes = [1, 1024], strides = [1, 1]} : vector<3x1024xf32> to vector<1x1024xf32>
    %c0_1 = arith.constant 0 : index
    %c0_2 = arith.constant 0 : index
    %4 = vector.load %arg5[%c0_1, %c0_2] : memref<32x3xf32, #tpu.memory_space<vmem>>, vector<32x3xf32>
    %cst = arith.constant dense<0.000000e+00> : vector<32x1024xf32>
    %5 = tpu.matmul %4, %0, %cst {dimension_numbers = #tpu.dot_dimension_numbers<[1], [0], [0], [1], [0, 0, 1, 1], [], []>} : vector<32x3xf32>, vector<3x1024xf32>, vector<32x1024xf32> -> vector<32x1024xf32>
    %c0_3 = arith.constant 0 : index
    %c0_4 = arith.constant 0 : index
    %6 = vector.load %arg6[%c0_3, %c0_4] : memref<32x1xf32, #tpu.memory_space<vmem>>, vector<32x1xf32>
    %7 = vector.broadcast %6 : vector<32x1xf32> to vector<32x1024xf32>
    %8 = arith.addf %5, %7 : vector<32x1024xf32>
    %9 = math.tanh %8 : vector<32x1024xf32>
    %c0_5 = arith.constant 0 : index
    %c0_6 = arith.constant 0 : index
    %10 = vector.load %arg7[%c0_5, %c0_6] : memref<32x32xf32, #tpu.memory_space<vmem>>, vector<32x32xf32>
    %cst_7 = arith.constant dense<0.000000e+00> : vector<32x1024xf32>
    %11 = tpu.matmul %10, %9, %cst_7 {dimension_numbers = #tpu.dot_dimension_numbers<[1], [0], [0], [1], [0, 0, 1, 1], [], []>} : vector<32x32xf32>, vector<32x1024xf32>, vector<32x1024xf32> -> vector<32x1024xf32>
    %c0_8 = arith.constant 0 : index
    %c0_9 = arith.constant 0 : index
    %12 = vector.load %arg8[%c0_8, %c0_9] : memref<32x1xf32, #tpu.memory_space<vmem>>, vector<32x1xf32>
    %13 = vector.broadcast %12 : vector<32x1xf32> to vector<32x1024xf32>
    %14 = arith.addf %11, %13 : vector<32x1024xf32>
    %15 = math.tanh %14 : vector<32x1024xf32>
    %c0_10 = arith.constant 0 : index
    %c0_11 = arith.constant 0 : index
    %16 = vector.load %arg9[%c0_10, %c0_11] : memref<1x32xf32, #tpu.memory_space<vmem>>, vector<1x32xf32>
    %cst_12 = arith.constant dense<0.000000e+00> : vector<1x1024xf32>
    %17 = tpu.matmul %16, %15, %cst_12 {dimension_numbers = #tpu.dot_dimension_numbers<[1], [0], [0], [1], [0, 0, 1, 1], [], []>} : vector<1x32xf32>, vector<32x1024xf32>, vector<1x1024xf32> -> vector<1x1024xf32>
    %c0_13 = arith.constant 0 : index
    %18 = memref.load %arg1[%c0_13] : memref<1xf32, #tpu.memory_space<smem>>
    %19 = vector.broadcast %18 : f32 to vector<1x1024xf32>
    %20 = arith.addf %17, %19 : vector<1x1024xf32>
    %21 = vector.extract_strided_slice %0 {offsets = [0, 0], sizes = [2, 1024], strides = [1, 1]} : vector<3x1024xf32> to vector<2x1024xf32>
    %c0_14 = arith.constant 0 : index
    %c0_15 = arith.constant 0 : index
    %22 = vector.load %arg3[%c0_14, %c0_15] : memref<2x1xf32, #tpu.memory_space<vmem>>, vector<2x1xf32>
    %23 = vector.broadcast %22 : vector<2x1xf32> to vector<2x1024xf32>
    %24 = arith.subf %21, %23 : vector<2x1024xf32>
    %c0_16 = arith.constant 0 : index
    %c0_17 = arith.constant 0 : index
    %25 = vector.load %arg4[%c0_16, %c0_17] : memref<2x1xf32, #tpu.memory_space<vmem>>, vector<2x1xf32>
    %26 = vector.broadcast %25 : vector<2x1xf32> to vector<2x1024xf32>
    %27 = arith.subf %21, %26 : vector<2x1024xf32>
    %28 = arith.mulf %24, %27 : vector<2x1024xf32>
    %29 = vector.extract_strided_slice %28 {offsets = [0, 0], sizes = [1, 1024], strides = [1, 1]} : vector<2x1024xf32> to vector<1x1024xf32>
    %30 = vector.extract_strided_slice %28 {offsets = [1, 0], sizes = [1, 1024], strides = [1, 1]} : vector<2x1024xf32> to vector<1x1024xf32>
    %31 = arith.mulf %29, %30 : vector<1x1024xf32>
    %32 = arith.mulf %31, %3 : vector<1x1024xf32>
    %33 = arith.mulf %32, %20 : vector<1x1024xf32>
    %34 = math.sin %1 : vector<1x1024xf32>
    %35 = math.cos %2 : vector<1x1024xf32>
    %36 = arith.mulf %34, %35 : vector<1x1024xf32>
    %37 = arith.mulf %36, %3 : vector<1x1024xf32>
    %38 = arith.addf %33, %37 : vector<1x1024xf32>
    %c0_18 = arith.constant 0 : index
    %c0_19 = arith.constant 0 : index
    %39 = vector.load %arg10[%c0_18, %c0_19] : memref<1x1024xf32, #tpu.memory_space<vmem>>, vector<1x1024xf32>
    tpu.vector_store %arg10[%c0_18, %c0_19], %38 {strides = array<i32>} : memref<1x1024xf32, #tpu.memory_space<vmem>>, vector<1x1024xf32>,
    return
  }
  func.func @transform_0(%arg0: i32) -> i32 {
    %c0_i32 = arith.constant 0 : i32
    %c0_i32_0 = arith.constant 0 : i32
    return %c0_i32 : i32
  }
  func.func @transform_1(%arg0: i32) -> (i32, i32) {
    %c0_i32 = arith.constant 0 : i32
    %c0_i32_0 = arith.constant 0 : i32
    return %c0_i32, %arg0 : i32, i32
  }
  func.func @transform_2(%arg0: i32) -> (i32, i32) {
    %c0_i32 = arith.constant 0 : i32
    %c0_i32_0 = arith.constant 0 : i32
    %c0_i32_1 = arith.constant 0 : i32
    return %c0_i32, %c0_i32_0 : i32, i32
  }
  func.func @transform_3(%arg0: i32) -> (i32, i32) {
    %c0_i32 = arith.constant 0 : i32
    %c0_i32_0 = arith.constant 0 : i32
    %c0_i32_1 = arith.constant 0 : i32
    return %c0_i32, %c0_i32_0 : i32, i32
  }
  func.func @transform_4(%arg0: i32) -> (i32, i32) {
    %c0_i32 = arith.constant 0 : i32
    %c0_i32_0 = arith.constant 0 : i32
    %c0_i32_1 = arith.constant 0 : i32
    return %c0_i32, %c0_i32_0 : i32, i32
  }
  func.func @transform_5(%arg0: i32) -> (i32, i32) {
    %c0_i32 = arith.constant 0 : i32
    %c0_i32_0 = arith.constant 0 : i32
    %c0_i32_1 = arith.constant 0 : i32
    return %c0_i32, %c0_i32_0 : i32, i32
  }
  func.func @transform_6(%arg0: i32) -> (i32, i32) {
    %c0_i32 = arith.constant 0 : i32
    %c0_i32_0 = arith.constant 0 : i32
    %c0_i32_1 = arith.constant 0 : i32
    return %c0_i32, %c0_i32_0 : i32, i32
  }
  func.func @transform_7(%arg0: i32) -> (i32, i32) {
    %c0_i32 = arith.constant 0 : i32
    %c0_i32_0 = arith.constant 0 : i32
    %c0_i32_1 = arith.constant 0 : i32
    return %c0_i32, %c0_i32_0 : i32, i32
  }
  func.func @transform_8(%arg0: i32) -> (i32, i32) {
    %c0_i32 = arith.constant 0 : i32
    %c0_i32_0 = arith.constant 0 : i32
    %c0_i32_1 = arith.constant 0 : i32
    return %c0_i32, %c0_i32_0 : i32, i32
  }
  func.func @transform_9(%arg0: i32) -> (i32, i32) {
    %c0_i32 = arith.constant 0 : i32
    %c0_i32_0 = arith.constant 0 : i32
    return %c0_i32, %arg0 : i32, i32
  }
}

</mosaic_0001>

<bundles_post_ra>
// kernel: tpu_custom_call.1
= control target key start
LH: loop header
LB: loop body
LE: loop exit
PB: predicated region body
PF: predicated region fallthrough
CT: control target
= control target key end

     0   :  { %s3907_s0 = inlined_call_operand.<no memory space> [shape: f32[1], index: 0, kind: input, shape index: {}]   ;;  %s3908_s1 = inlined_call_operand.vmem [shape: f32[3,2048], index: 1, kind: input, shape index: {}]   ;;  %s3909_s2 = inlined_call_operand.vmem [shape: f32[2,1], index: 2, kind: input, shape index: {}]   ;;  %s3910_s3 = inlined_call_operand.vmem [shape: f32[2,1], index: 3, kind: input, shape index: {}]   ;;  %s3911_s4 = inlined_call_operand.vmem [shape: f32[32,3], index: 4, kind: input, shape index: {}]   ;;  %s3912_s5 = inlined_call_operand.vmem [shape: f32[32,1], index: 5, kind: input, shape index: {}]   ;;  %s3913_s6 = inlined_call_operand.vmem [shape: f32[32,32], index: 6, kind: input, shape index: {}]   ;;  %s3914_s7 = inlined_call_operand.vmem [shape: f32[32,1], index: 7, kind: input, shape index: {}]   ;;  %s3915_s8 = inlined_call_operand.vmem [shape: f32[1,32], index: 8, kind: input, shape index: {}]   ;;  %s3916_s9 = inlined_call_operand.hbm [shape: f32[1,2048], index: 9, kind: output, shape index: {}]  }
   0x1   :  { %14 = sst [smem:[#allocation2]] %s3907_s0 }
   0x2   :  { %15 = vsyncpa [#allocation4], 0 }
   0x3   :  { %17 = vsyncpa [#allocation4 + $0x1], 0  ;;  %s3095_s11 = smov 0   ;;  %s3097_s12 = smov 0  }
   0x4   :  { %s3099_s13 = smov 0   ;;  %s3101_s14 = smov 0  }
   0x5 LB: > { %s3116_s0 = sadd.s32 4294967295, %s3029_s14   ;;  %s2587_s15 = sadd.s32 4294967294, %s3029_s14   ;;  %s3029_s14 = sphi %s3101_s14, %s3930_s14   ;;  %s3025_s13 = sphi %s3099_s13, %s3929_s13   ;;  %s3021_s12 = sphi %s3097_s12, %s3928_s12   ;;  %s3017_s11 = sphi %s3095_s11, %s3927_s11  }
   0x6   : > { %s3120_s16 = sadd.s32 1, %s3029_s14   ;;  %s224_s17 = sadd.s32 1, %s3025_s13 }
   0x7   : > { %s221_s18 = ssub.s32 %s3029_s14, %s3120_s16  ;;  %p234_p0 = scmp.ne.s32.totalorder %s3025_s13, %s3021_s12 }
   0x8   : > { %p222_p1 = scmp.eq.s32.totalorder %s221_s18, 0  ;;  %p235_p2 = scmp.eq.s32.totalorder %s3116_s0, 1 }
   0x9   : > { %p240_p3 = scmp.ne.s32.totalorder %s3021_s12, %s3017_s11  ;;  %p241_p4 = scmp.eq.s32.totalorder %s2587_s15, 1 }
   0xa   : > { %s3131_s19 = scalar_select %p222_p1, %s3025_s13, %s224_s17  }
   0xb   : > { %p3133_p5 = por %p235_p2, %p234_p0  ;;  %p3137_p6 = por %p241_p4, %p240_p3 }
   0xc   : > { %p2590_p7 = scmp.ge.s32.totalorder %s3029_s14, 1  ;;  %p292_p8 = scmp.lt.s32.totalorder %s3029_s14, 3 }
   0xe   : > { %p293_p9 = pnand %p2590_p7, %p292_p8 }
   0xf   : > { %s2592_s22 = sshll.u32 (!%p293_p9), %s3116_s0, 3  ;;  %v3031_v0 = vmov (!%p293_p9), 0.0   ;;  %v345_v1 = vld [vmem:[%s3912_s5 + $0x10] sm:$0xff] (!%p293_p9)  ;;  %v3032_v2 = vmov (!%p293_p9), 0   ;;  %v343_v3 = vld [vmem:[%s3912_s5] sm:$0xff] (!%p293_p9)  ;;  %v346_v4 = vld [vmem:[%s3912_s5 + $0x18] sm:$0xff] (!%p293_p9) }
  0x10   : > { %296 = sbr.rel (%p293_p9) target bundleno = 784 (0x310), region = 56  ;;  %p329_p10 = scmp.lt.s32.totalorder (!%p293_p9), %s2592_s22, 15  ;;  %469 = vmatprep.mubr.f32.mxu0 (!%p293_p9), %v3031_v0  ;;  %558 = vmatprep.mubr.f32.mxu1 (!%p293_p9), %v3031_v0  ;;  %v344_v5 = vld [vmem:[%s3912_s5 + $0x8] sm:$0xff] (!%p293_p9)  ;;  %vm388_vm0 = vcmask (!%p293_p9), 1042432   ;;  %v339_v12 = vld [vmem:[%s3911_s4] sm:$0xff] (!%p293_p9)  ;;  %vm375_vm1 = vcmask (!%p293_p9), 23552  }
  0x11   : > { %2814 = vset.pattern.permute.xlu1 (!%p293_p9), %v3032_v2  ;;  %2813 = vset.pattern.permute.xlu0 (!%p293_p9), %v3032_v2  ;;  %v340_v15 = vld [vmem:[%s3911_s4 + $0x8] sm:$0xff] (!%p293_p9)  ;;  %v797_v17 = vld [vmem:[%s3914_s7] sm:$0xff] (!%p293_p9)  ;;  %v341_v18 = vld [vmem:[%s3911_s4 + $0x10] sm:$0xff] (!%p293_p9)  ;;  %vm821_vm2 = vcmask (!%p293_p9), 261120   ;;  %s325_s28 = sand.u32 (!%p293_p9), 1, %s3021_s12   ;;  %s2683_s30 = sshll.u32 (!%p293_p9), %s3116_s0, 7 }
  0x12   : > { %359 = vperm.xlu1 (!%p293_p9), %2814, %v345_v1   ;;  %349 = vperm.xlu0 (!%p293_p9), %2813, %v343_v3   ;;  %v798_v16 = vld [vmem:[%s3914_s7 + $0x8] sm:$0xff] (!%p293_p9)  ;;  %v800_v19 = vld [vmem:[%s3914_s7 + $0x18] sm:$0xff] (!%p293_p9)  ;;  %v799_v20 = vld [vmem:[%s3914_s7 + $0x10] sm:$0xff] (!%p293_p9)  ;;  %s2591_s29 = sshll.u32 (!%p293_p9), %s325_s28, 3  ;;  %s3865_s23 = scalar_lea.hbm (!%p293_p9), %s3916_s9, %s2683_s30 }
  0x13   : > { %v342_v21 = vld [vmem:[%s3911_s4 + $0x18] sm:$0xff] (!%p293_p9)  ;;  %v1529_v22 = vld [vmem:[%s3910_s3] sm:$0x3] (!%p293_p9)  ;;  %s2514_s24 = scalar_lea.sflag (!%p293_p9), [#allocation4], %s325_s28  ;;  %s3041_s25 = smov (!%p293_p9), [#allocation3]  }
  0x14   : > { %v1512_v23 = vld [vmem:[%s3909_s2] sm:$0x3] (!%p293_p9)  ;;  %s2971_s26 = sshll.u32 (!%p293_p9), %s3041_s25, 4  ;;  %s2972_s26 = int_to_ptr.vmem [resolvable:$false] %s2971_s26 }
  0x15   : > { %s2973_s27 = scalar_lea.vmem (!%p293_p9), %s2972_s26, 256 }
  0x16   : > { %364 = vperm.xlu1 (!%p293_p9), %2814, %v346_v4   ;;  %354 = vperm.xlu0 (!%p293_p9), %2813, %v344_v5  }
  0x17   : > { %s3932_s22 = smov (!%p329_p10, %s2592_s22), 15 }
  0x18   : > { %s2593_s10 = sshll.u32 %s3932_s22, 2 }
  0x19   : > { %s3161_s18 = scalar_lea.vmem %s3908_s1, %s2593_s10  ;;  %s327_s10 = scalar_lea.vmem [#allocation3], %s2591_s29 }
  0x1a   : > { %v3164_v6 = vld [vmem:[%s3161_s18] sm:$0x77]  ;;  %v3167_v7 = vld [vmem:[%s3161_s18 + $0x8] sm:$0x77]  ;;  %v3170_v8 = vld [vmem:[%s3161_s18 + $0x10] sm:$0x77]  ;;  %808 = vperm.xlu1 %2814, %v798_v16   ;;  %803 = vperm.xlu0 %2813, %v797_v17  }
  0x1b   : > { %v371_v9 = vcombine.high %v3164_v6, %v3164_v6  ;;  %v372_v10 = vcombine.high %v3167_v7, %v3167_v7  ;;  %v3177_v11 = vld [vmem:[%s3161_s18 + $0x18] sm:$0x77]  ;;  %v373_v13 = vcombine.high %v3170_v8, %v3170_v8  ;;  %s2528_s15 = sshll.u32 %s327_s10, 4  ;;  %s3867_s15 = int_to_ptr.vmem [resolvable:$true] %s2528_s15 }
  0x1c   : > { %v374_v14 = vcombine.high %v3177_v11, %v3177_v11  ;;  %s2967_s0 = scalar_lea.vmem %s3867_s15, 128  ;;  %p2974_p0 = scmp.lt.s32.totalorder %s3867_s15, %s2972_s26 }
  0x1d   : > { %2594 = vmatprep.subr.msk.mxu0 %vm388_vm0, %v371_v9  ;;  %2600 = vmatprep.subr.msk.mxu1 %vm388_vm0, %v372_v10  ;;  %p2968_p11 = scmp.ne.s32.totalorder %s3867_s15, %s2967_s0  ;;  %p2975_p1 = scmp.lt.s32.totalorder %s2973_s27, %s2967_s0 }
  0x1e   : > { %2595 = vmatpush1.msk.msra.mxu0 %vm388_vm0, %v3164_v6  ;;  %2601 = vmatpush1.msk.msra.mxu1 %vm388_vm0, %v3167_v7 }
  0x1f   : > { %2596 = vmatmul.mubr.msk.f32.vlgmr.msra.gmra.mrb[0].mxu0 %vm375_vm1, %v339_v12  ;;  %2602 = vmatmul.mubr.msk.f32.vlgmr.msra.gmra.mrb[0].mxu1 %vm375_vm1, %v339_v12  ;;  %p2969_p12 = pnand %p2968_p11, %p3133_p5  ;;  %p2976_p2 = por %p2975_p1, %p2974_p0 }
  0x20   : > { %475 = vmatprep.mubr.f32.mxu0 %v3031_v0  ;;  %564 = vmatprep.mubr.f32.mxu1 %v3031_v0 }
  0x21   : > { %2606 = vmatprep.subr.msk.mxu0 %vm388_vm0, %v373_v13  ;;  %2612 = vmatprep.subr.msk.mxu1 %vm388_vm0, %v374_v14  ;;  %p2970_p13 = pneg %p2969_p12 }
  0x22   : > { %2607 = vmatpush1.msk.msra.mxu0 %vm388_vm0, %v3170_v8  ;;  %2613 = vmatpush1.msk.msra.mxu1 %vm388_vm0, %v3177_v11 }
  0x23   : > { %2597 = vmatmul.mubr.msk.f32.gmra.mrb[2].mxu0 %vm375_vm1, %v340_v15  ;;  %2603 = vmatmul.mubr.msk.f32.gmra.mrb[2].mxu1 %vm375_vm1, %v340_v15  ;;  %p2977_p3 = pnand %p2976_p2, %p2970_p13 }
  0x24   : > { %481 = vmatprep.mubr.f32.mxu0 %v3031_v0  ;;  %570 = vmatprep.mubr.f32.mxu1 %v3031_v0 }
  0x25   : > { %818 = vperm.xlu1 %2814, %v800_v19   ;;  %813 = vperm.xlu0 %2813, %v799_v20  }
  0x27   : > { %2598 = vmatmul.mubr.msk.f32.gmra.mrb[4].mxu0 %vm375_vm1, %v341_v18  ;;  %2604 = vmatmul.mubr.msk.f32.gmra.mrb[4].mxu1 %vm375_vm1, %v341_v18 }
  0x28   : > { %487 = vmatprep.mubr.f32.mxu0 %v3031_v0  ;;  %576 = vmatprep.mubr.f32.mxu1 %v3031_v0 }
  0x29   : > { %1532 = vperm.xlu1 %2814, %v1529_v22   ;;  %1515 = vperm.xlu0 %2813, %v1512_v23  }
  0x2b   : > { %2599 = vmatmul.mubr.msk.f32.gmra.mrb[6].mxu0 %vm375_vm1, %v342_v21  ;;  %2605 = vmatmul.mubr.msk.f32.gmra.mrb[6].mxu1 %vm375_vm1, %v342_v21 }
  0x2c   : > { %647 = vmatprep.mubr.f32.mxu0 %v3031_v0  ;;  %736 = vmatprep.mubr.f32.mxu1 %v3031_v0 }
  0x2f   : > { %2608 = vmatmul.mubr.msk.f32.vlgmr.msra.gmra.mrb[8].mxu0 %vm375_vm1, %v339_v12  ;;  %2614 = vmatmul.mubr.msk.f32.vlgmr.msra.gmra.mrb[8].mxu1 %vm375_vm1, %v339_v12 }
  0x30   : > { %653 = vmatprep.mubr.f32.mxu0 %v3031_v0  ;;  %742 = vmatprep.mubr.f32.mxu1 %v3031_v0 }
  0x33   : > { %2609 = vmatmul.mubr.msk.f32.gmra.mrb[10].mxu0 %vm375_vm1, %v340_v15  ;;  %2615 = vmatmul.mubr.msk.f32.gmra.mrb[10].mxu1 %vm375_vm1, %v340_v15 }
  0x34   : > { %659 = vmatprep.mubr.f32.mxu0 %v3031_v0  ;;  %748 = vmatprep.mubr.f32.mxu1 %v3031_v0 }
  0x37   : > { %2610 = vmatmul.mubr.msk.f32.gmra.mrb[12].mxu0 %vm375_vm1, %v341_v18  ;;  %2616 = vmatmul.mubr.msk.f32.gmra.mrb[12].mxu1 %vm375_vm1, %v341_v18 }
  0x38   : > { %665 = vmatprep.mubr.f32.mxu0 %v3031_v0  ;;  %754 = vmatprep.mubr.f32.mxu1 %v3031_v0 }
  0x3b   : > { %2611 = vmatmul.mubr.msk.f32.gmra.mrb[14].mxu0 %vm375_vm1, %v342_v21  ;;  %2617 = vmatmul.mubr.msk.f32.gmra.mrb[14].mxu1 %vm375_vm1, %v342_v21 }
  0x3c   : > { %898 = vmatprep.mubr.f32.mxu0 %v3031_v0  ;;  %987 = vmatprep.mubr.f32.mxu1 %v3031_v0 }
  0x91   : > { %v3257_v24 = vpop.permute.xlu0 %349  ;;  %v3263_v33 = vpop.permute.xlu1 %359 }
  0x95   : > { %v3265_v34 = vpop.permute.xlu0 %354  ;;  %v3275_v51 = vpop.permute.xlu1 %364 }
  0xf2   : > { %v471_v25 = vpop.f32.mrb[0].mxu0  ;;  %v560_v26 = vpop.f32.mrb[0].mxu1 }
  0xf3   : > { %v472_v27 = vadd.f32 %v471_v25, %v3257_v24  ;;  %v561_v28 = vadd.f32 %v560_v26, %v3257_v24  ;;  %v473_v29 = vpop.f32.mrb[1].mxu0  ;;  %v562_v30 = vpop.f32.mrb[1].mxu1 }
  0xf4   : > { %v474_v31 = vadd.f32 %v473_v29, %v3257_v24  ;;  %v563_v32 = vadd.f32 %v562_v30, %v3257_v24 }
  0xf5   : > { %2819 = vtanh.f32 %v472_v27 }
  0xf6   : > { %2821 = vtanh.f32 %v561_v28  ;;  %v477_v35 = vpop.f32.mrb[2].mxu0  ;;  %v566_v36 = vpop.f32.mrb[2].mxu1 }
  0xf7   : > { %2823 = vtanh.f32 %v474_v31  ;;  %v478_v37 = vadd.f32 %v477_v35, %v3265_v34  ;;  %v567_v38 = vadd.f32 %v566_v36, %v3265_v34  ;;  %v479_v39 = vpop.f32.mrb[3].mxu0  ;;  %v568_v40 = vpop.f32.mrb[3].mxu1 }
  0xf8   : > { %2825 = vtanh.f32 %v563_v32  ;;  %v480_v41 = vadd.f32 %v479_v39, %v3265_v34  ;;  %v569_v42 = vadd.f32 %v568_v40, %v3265_v34 }
  0xf9   : > { %2827 = vtanh.f32 %v478_v37 }
  0xfa   : > { %2829 = vtanh.f32 %v567_v38  ;;  %v483_v43 = vpop.f32.mrb[4].mxu0  ;;  %v572_v44 = vpop.f32.mrb[4].mxu1 }
  0xfb   : > { %2831 = vtanh.f32 %v480_v41  ;;  %v484_v45 = vadd.f32 %v483_v43, %v3263_v33  ;;  %v573_v46 = vadd.f32 %v572_v44, %v3263_v33  ;;  %v485_v47 = vpop.f32.mrb[5].mxu0  ;;  %v574_v48 = vpop.f32.mrb[5].mxu1 }
  0xfc   : > { %2833 = vtanh.f32 %v569_v42  ;;  %v486_v49 = vadd.f32 %v485_v47, %v3263_v33  ;;  %v575_v50 = vadd.f32 %v574_v48, %v3263_v33 }
  0xfd   : > { %2835 = vtanh.f32 %v484_v45 }
  0xfe   : > { %2837 = vtanh.f32 %v573_v46  ;;  %v489_v52 = vpop.f32.mrb[6].mxu0  ;;  %v578_v53 = vpop.f32.mrb[6].mxu1 }
  0xff   : > { %v2820_v54 = vpop.eup %2819  ;;  %2839 = vtanh.f32 %v486_v49  ;;  %v490_v55 = vadd.f32 %v489_v52, %v3275_v51  ;;  %v579_v56 = vadd.f32 %v578_v53, %v3275_v51  ;;  %v491_v57 = vpop.f32.mrb[7].mxu0 }
 0x100   : > { %v580_v58 = vpop.f32.mrb[7].mxu1  ;;  %v2822_v59 = vpop.eup %2821  ;;  %2841 = vtanh.f32 %v575_v50  ;;  %v492_v60 = vadd.f32 %v491_v57, %v3275_v51 }
 0x101   : > { %v581_v61 = vadd.f32 %v580_v58, %v3275_v51  ;;  %v2824_v62 = vpop.eup %2823  ;;  %2843 = vtanh.f32 %v490_v55 }
 0x102   : > { %v2826_v63 = vpop.eup %2825  ;;  %2845 = vtanh.f32 %v579_v56  ;;  %v649_v1 = vpop.f32.mrb[8].mxu0 }
 0x103   : > { %v738_v2 = vpop.f32.mrb[8].mxu1  ;;  %v2828_v3 = vpop.eup %2827  ;;  %2847 = vtanh.f32 %v492_v60  ;;  %v650_v4 = vadd.f32 %v649_v1, %v3257_v24 }
 0x104   : > { %v739_v5 = vadd.f32 %v738_v2, %v3257_v24  ;;  %v651_v9 = vpop.f32.mrb[9].mxu0  ;;  %v740_v10 = vpop.f32.mrb[9].mxu1  ;;  %2849 = vtanh.f32 %v581_v61  ;;  %v2686_v15 = vpack.c.bf16 %v2828_v3, %v2820_v54  ;;  %v793_v61 = vld [vmem:[%s3913_s6] sm:$0xff]  ;;  %v794_v3 = vld [vmem:[%s3913_s6 + $0x8] sm:$0xff] }
 0x105   : > { %v2830_v12 = vpop.eup %2829  ;;  %v652_v13 = vadd.f32 %v651_v9, %v3257_v24  ;;  %v741_v14 = vadd.f32 %v740_v10, %v3257_v24  ;;  %2851 = vtanh.f32 %v650_v4 }
 0x106   : > { %v2832_v16 = vpop.eup %2831  ;;  %v2694_v17 = vpack.c.bf16 %v2830_v12, %v2822_v59  ;;  %2853 = vtanh.f32 %v739_v5  ;;  %v655_v19 = vpop.f32.mrb[10].mxu0 }
 0x107   : > { %v2834_v18 = vpop.eup %2833  ;;  %v744_v20 = vpop.f32.mrb[10].mxu1  ;;  %v2684_v21 = vpack.c.bf16 %v2832_v16, %v2824_v62  ;;  %2855 = vtanh.f32 %v652_v13  ;;  %v656_v23 = vadd.f32 %v655_v19, %v3265_v34 }
 0x108   : > { %v2836_v22 = vpop.eup %2835  ;;  %v745_v25 = vadd.f32 %v744_v20, %v3265_v34  ;;  %v657_v26 = vpop.f32.mrb[11].mxu0  ;;  %v2692_v28 = vpack.c.bf16 %v2834_v18, %v2826_v63  ;;  %2857 = vtanh.f32 %v741_v14 }
 0x109   : > { %v746_v27 = vpop.f32.mrb[11].mxu1  ;;  %v2838_v29 = vpop.eup %2837  ;;  %v658_v24 = vadd.f32 %v657_v26, %v3265_v34  ;;  %2685 = vmatprep.subr.bf16.mxu0 %v2684_v21  ;;  %2859 = vtanh.f32 %v656_v23  ;;  %v796_v21 = vld [vmem:[%s3913_s6 + $0x18] sm:$0xff] }
 0x10a   : > { %v747_v30 = vadd.f32 %v746_v27, %v3265_v34  ;;  %v2840_v31 = vpop.eup %2839  ;;  %2693 = vmatprep.subr.bf16.mxu1 %v2692_v28  ;;  %2687 = vmatpush1.bf16.msra.mxu0 %v2686_v15  ;;  %2861 = vtanh.f32 %v745_v25  ;;  %v661_v35 = vpop.f32.mrb[12].mxu0  ;;  %v795_v15 = vld [vmem:[%s3913_s6 + $0x10] sm:$0xff] }
 0x10b   : > { %v2842_v32 = vpop.eup %2841  ;;  %2695 = vmatpush1.bf16.msra.mxu1 %v2694_v17  ;;  %v750_v36 = vpop.f32.mrb[12].mxu1  ;;  %2863 = vtanh.f32 %v658_v24  ;;  %v662_v38 = vadd.f32 %v661_v35, %v3263_v33 }
 0x10c   : > { %v2844_v37 = vpop.eup %2843  ;;  %v751_v39 = vadd.f32 %v750_v36, %v3263_v33  ;;  %v663_v40 = vpop.f32.mrb[13].mxu0  ;;  %2865 = vtanh.f32 %v747_v30 }
 0x10d   : > { %v752_v41 = vpop.f32.mrb[13].mxu1  ;;  %v2846_v42 = vpop.eup %2845  ;;  %v664_v34 = vadd.f32 %v663_v40, %v3263_v33  ;;  %v2690_v44 = vpack.c.bf16 %v2844_v37, %v2836_v22  ;;  %2867 = vtanh.f32 %v662_v38 }
 0x10e   : > { %v753_v43 = vadd.f32 %v752_v41, %v3263_v33  ;;  %v2848_v45 = vpop.eup %2847  ;;  %v2698_v46 = vpack.c.bf16 %v2846_v42, %v2838_v29  ;;  %2869 = vtanh.f32 %v751_v39  ;;  %v667_v48 = vpop.f32.mrb[14].mxu0 }
 0x10f   : > { %v2850_v47 = vpop.eup %2849  ;;  %v756_v49 = vpop.f32.mrb[14].mxu1  ;;  %v2688_v50 = vpack.c.bf16 %v2848_v45, %v2840_v31  ;;  %2871 = vtanh.f32 %v664_v34  ;;  %v668_v53 = vadd.f32 %v667_v48, %v3275_v51 }
 0x110   : > { %v2852_v52 = vpop.eup %2851  ;;  %v757_v54 = vadd.f32 %v756_v49, %v3275_v51  ;;  %v669_v55 = vpop.f32.mrb[15].mxu0  ;;  %v2696_v57 = vpack.c.bf16 %v2850_v47, %v2842_v32  ;;  %2873 = vtanh.f32 %v753_v43 }
 0x111   : > { %v758_v56 = vpop.f32.mrb[15].mxu1  ;;  %v2854_v58 = vpop.eup %2853  ;;  %v670_v33 = vadd.f32 %v669_v55, %v3275_v51  ;;  %2689 = vmatprep.subr.bf16.mxu0 %v2688_v50  ;;  %2875 = vtanh.f32 %v668_v53 }
 0x112   : > { %v759_v59 = vadd.f32 %v758_v56, %v3275_v51  ;;  %v2856_v60 = vpop.eup %2855  ;;  %2697 = vmatprep.subr.bf16.mxu1 %v2696_v57  ;;  %2691 = vmatpush1.bf16.msra.mxu0 %v2690_v44  ;;  %2877 = vtanh.f32 %v757_v54  ;;  %v3341_v27 = vpop.permute.xlu0 %803 }
 0x113   : > { %v2858_v62 = vpop.eup %2857  ;;  %2699 = vmatpush1.bf16.msra.mxu1 %v2698_v46  ;;  %2879 = vtanh.f32 %v670_v33  ;;  %v3347_v37 = vpop.permute.xlu1 %808 }
 0x114   : > { %v2860_v63 = vpop.eup %2859  ;;  %2881 = vtanh.f32 %v759_v59 }
 0x115   : > { %v2862_v1 = vpop.eup %2861  ;;  %2618 = vmatmul.mubr.msk.f32.vlgmr.msra.gmra.mrb[16].mxu0 %vm821_vm2, %v793_v61  ;;  %v2702_v51 = vpack.c.bf16 %v2860_v63, %v2852_v52 }
 0x116   : > { %v2864_v2 = vpop.eup %2863  ;;  %2622 = vmatmul.mubr.msk.f32.vlgmr.msra.gmra.mrb[16].mxu1 %vm821_vm2, %v793_v61  ;;  %904 = vmatprep.mubr.f32.mxu0 %v3031_v0  ;;  %v2710_v4 = vpack.c.bf16 %v2862_v1, %v2854_v58  ;;  %v3353_v45 = vpop.permute.xlu0 %813 }
 0x117   : > { %v2866_v5 = vpop.eup %2865  ;;  %993 = vmatprep.mubr.f32.mxu1 %v3031_v0  ;;  %v2700_v9 = vpack.c.bf16 %v2864_v2, %v2856_v60  ;;  %v3359_v55 = vpop.permute.xlu1 %818 }
 0x118   : > { %v2868_v10 = vpop.eup %2867  ;;  %v2708_v12 = vpack.c.bf16 %v2866_v5, %v2858_v62 }
 0x119   : > { %v2870_v13 = vpop.eup %2869  ;;  %2619 = vmatmul.mubr.msk.f32.gmra.mrb[18].mxu0 %vm821_vm2, %v794_v3  ;;  %2701 = vmatprep.subr.bf16.mxu0 %v2700_v9 }
 0x11a   : > { %v2872_v14 = vpop.eup %2871  ;;  %2623 = vmatmul.mubr.msk.f32.gmra.mrb[18].mxu1 %vm821_vm2, %v794_v3  ;;  %2709 = vmatprep.subr.bf16.mxu1 %v2708_v12 }
 0x11b   : > { %v2874_v16 = vpop.eup %2873  ;;  %2703 = vmatpush1.bf16.msra.mxu0 %v2702_v51  ;;  %2711 = vmatpush1.bf16.msra.mxu1 %v2710_v4 }
 0x11c   : > { %v2876_v17 = vpop.eup %2875  ;;  %910 = vmatprep.mubr.f32.mxu0 %v3031_v0  ;;  %999 = vmatprep.mubr.f32.mxu1 %v3031_v0 }
 0x11d   : > { %v2878_v18 = vpop.eup %2877  ;;  %2620 = vmatmul.mubr.msk.f32.gmra.mrb[20].mxu0 %vm821_vm2, %v795_v15  ;;  %v2706_v19 = vpack.c.bf16 %v2876_v17, %v2868_v10 }
 0x11e   : > { %v2880_v20 = vpop.eup %2879  ;;  %2624 = vmatmul.mubr.msk.f32.gmra.mrb[20].mxu1 %vm821_vm2, %v795_v15  ;;  %916 = vmatprep.mubr.f32.mxu0 %v3031_v0  ;;  %v2714_v22 = vpack.c.bf16 %v2878_v18, %v2870_v13 }
 0x11f   : > { %v2882_v23 = vpop.eup %2881  ;;  %1005 = vmatprep.mubr.f32.mxu1 %v3031_v0  ;;  %v2704_v25 = vpack.c.bf16 %v2880_v20, %v2872_v14 }
 0x120   : > { %v2712_v26 = vpack.c.bf16 %v2882_v23, %v2874_v16 }
 0x121   : > { %2621 = vmatmul.mubr.msk.f32.gmra.mrb[22].mxu0 %vm821_vm2, %v796_v21  ;;  %2705 = vmatprep.subr.bf16.mxu0 %v2704_v25 }
 0x122   : > { %2625 = vmatmul.mubr.msk.f32.gmra.mrb[22].mxu1 %vm821_vm2, %v796_v21  ;;  %2713 = vmatprep.subr.bf16.mxu1 %v2712_v26 }
 0x123   : > { %2707 = vmatpush1.bf16.msra.mxu0 %v2706_v19  ;;  %2715 = vmatpush1.bf16.msra.mxu1 %v2714_v22 }
 0x124   : > { %1076 = vmatprep.mubr.f32.mxu0 %v3031_v0  ;;  %1165 = vmatprep.mubr.f32.mxu1 %v3031_v0 }
 0x126   : > { %2626 = vmatmul.mubr.msk.f32.vlgmr.msra.gmra.mrb[24].mxu0 %vm821_vm2, %v793_v61  ;;  %2630 = vmatmul.mubr.msk.f32.vlgmr.msra.gmra.mrb[24].mxu1 %vm821_vm2, %v793_v61 }
 0x127   : > { %1082 = vmatprep.mubr.f32.mxu0 %v3031_v0  ;;  %1171 = vmatprep.mubr.f32.mxu1 %v3031_v0 }
 0x12a   : > { %2627 = vmatmul.mubr.msk.f32.gmra.mrb[26].mxu0 %vm821_vm2, %v794_v3  ;;  %2631 = vmatmul.mubr.msk.f32.gmra.mrb[26].mxu1 %vm821_vm2, %v794_v3 }
 0x12b   : > { %1088 = vmatprep.mubr.f32.mxu0 %v3031_v0  ;;  %1177 = vmatprep.mubr.f32.mxu1 %v3031_v0 }
 0x12e   : > { %2628 = vmatmul.mubr.msk.f32.gmra.mrb[28].mxu0 %vm821_vm2, %v795_v15  ;;  %2632 = vmatmul.mubr.msk.f32.gmra.mrb[28].mxu1 %vm821_vm2, %v795_v15 }
 0x12f   : > { %1094 = vmatprep.mubr.f32.mxu0 %v3031_v0  ;;  %1183 = vmatprep.mubr.f32.mxu1 %v3031_v0 }
 0x132   : > { %2629 = vmatmul.mubr.msk.f32.gmra.mrb[30].mxu0 %vm821_vm2, %v796_v21  ;;  %2633 = vmatmul.mubr.msk.f32.gmra.mrb[30].mxu1 %vm821_vm2, %v796_v21 }
 0x133   : > { %1292 = vmatprep.mubr.f32.mxu0 %v3031_v0  ;;  %1363 = vmatprep.mubr.f32.mxu1 %v3031_v0 }
 0x1e8   : > { %v900_v28 = vpop.f32.mrb[16].mxu0 }
 0x1e9   : > { %v901_v29 = vadd.f32 %v900_v28, %v3341_v27  ;;  %v989_v24 = vpop.f32.mrb[16].mxu1  ;;  %v902_v30 = vpop.f32.mrb[17].mxu0 }
 0x1ea   : > { %v990_v31 = vadd.f32 %v989_v24, %v3341_v27  ;;  %v903_v32 = vadd.f32 %v902_v30, %v3341_v27  ;;  %v991_v35 = vpop.f32.mrb[17].mxu1 }
 0x1eb   : > { %2883 = vtanh.f32 %v901_v29  ;;  %v992_v36 = vadd.f32 %v991_v35, %v3341_v27 }
 0x1ec   : > { %2885 = vtanh.f32 %v990_v31  ;;  %v906_v38 = vpop.f32.mrb[18].mxu0 }
 0x1ed   : > { %2887 = vtanh.f32 %v903_v32  ;;  %v907_v39 = vadd.f32 %v906_v38, %v3347_v37  ;;  %v995_v40 = vpop.f32.mrb[18].mxu1  ;;  %v908_v41 = vpop.f32.mrb[19].mxu0 }
 0x1ee   : > { %2889 = vtanh.f32 %v992_v36  ;;  %v996_v42 = vadd.f32 %v995_v40, %v3347_v37  ;;  %v909_v34 = vadd.f32 %v908_v41, %v3347_v37  ;;  %v997_v43 = vpop.f32.mrb[19].mxu1 }
 0x1ef   : > { %2891 = vtanh.f32 %v907_v39  ;;  %v998_v44 = vadd.f32 %v997_v43, %v3347_v37 }
 0x1f0   : > { %2893 = vtanh.f32 %v996_v42  ;;  %v912_v46 = vpop.f32.mrb[20].mxu0 }
 0x1f1   : > { %2895 = vtanh.f32 %v909_v34  ;;  %v913_v47 = vadd.f32 %v912_v46, %v3353_v45  ;;  %v1001_v48 = vpop.f32.mrb[20].mxu1  ;;  %v914_v49 = vpop.f32.mrb[21].mxu0 }
 0x1f2   : > { %2897 = vtanh.f32 %v998_v44  ;;  %v1002_v50 = vadd.f32 %v1001_v48, %v3353_v45  ;;  %v915_v52 = vadd.f32 %v914_v49, %v3353_v45  ;;  %v1003_v53 = vpop.f32.mrb[21].mxu1 }
 0x1f3   : > { %2899 = vtanh.f32 %v913_v47  ;;  %v1004_v54 = vadd.f32 %v1003_v53, %v3353_v45 }
 0x1f4   : > { %2901 = vtanh.f32 %v1002_v50  ;;  %v918_v56 = vpop.f32.mrb[22].mxu0 }
 0x1f5   : > { %v2884_v57 = vpop.eup %2883  ;;  %2903 = vtanh.f32 %v915_v52  ;;  %v919_v58 = vadd.f32 %v918_v56, %v3359_v55  ;;  %v1007_v33 = vpop.f32.mrb[22].mxu1 }
 0x1f6   : > { %v920_v59 = vpop.f32.mrb[23].mxu0  ;;  %v2886_v60 = vpop.eup %2885  ;;  %2905 = vtanh.f32 %v1004_v54  ;;  %v1008_v61 = vadd.f32 %v1007_v33, %v3359_v55 }
 0x1f7   : > { %v921_v62 = vadd.f32 %v920_v59, %v3359_v55  ;;  %v1009_v63 = vpop.f32.mrb[23].mxu1  ;;  %v2888_v1 = vpop.eup %2887  ;;  %2907 = vtanh.f32 %v919_v58 }
 0x1f8   : > { %v1010_v51 = vadd.f32 %v1009_v63, %v3359_v55  ;;  %v2890_v2 = vpop.eup %2889  ;;  %2909 = vtanh.f32 %v1008_v61  ;;  %v1222_v63 = vld [vmem:[%s3915_s8] sm:$0x1] }
 0x1f9   : > { %v2892_v3 = vpop.eup %2891  ;;  %2911 = vtanh.f32 %v921_v62  ;;  %v1078_v4 = vpop.f32.mrb[24].mxu0 }
 0x1fa   : > { %v1167_v5 = vpop.f32.mrb[24].mxu1  ;;  %v2894_v9 = vpop.eup %2893  ;;  %2913 = vtanh.f32 %v1010_v51  ;;  %v1079_v10 = vadd.f32 %v1078_v4, %v3341_v27  ;;  %v2718_v15 = vpack.c.bf16 %v2892_v3, %v2884_v57 }
 0x1fb   : > { %v1168_v12 = vadd.f32 %v1167_v5, %v3341_v27  ;;  %v1080_v13 = vpop.f32.mrb[25].mxu0  ;;  %v1169_v14 = vpop.f32.mrb[25].mxu1  ;;  %v2726_v19 = vpack.c.bf16 %v2894_v9, %v2886_v60 }
 0x1fc   : > { %v2896_v16 = vpop.eup %2895  ;;  %v1081_v17 = vadd.f32 %v1080_v13, %v3341_v27  ;;  %v1170_v18 = vadd.f32 %v1169_v14, %v3341_v27  ;;  %2915 = vtanh.f32 %v1079_v10 }
 0x1fd   : > { %v2898_v20 = vpop.eup %2897  ;;  %v2716_v21 = vpack.c.bf16 %v2896_v16, %v2888_v1  ;;  %2917 = vtanh.f32 %v1168_v12  ;;  %v1084_v23 = vpop.f32.mrb[26].mxu0 }
 0x1fe   : > { %v2900_v22 = vpop.eup %2899  ;;  %v1173_v25 = vpop.f32.mrb[26].mxu1  ;;  %v2724_v26 = vpack.c.bf16 %v2898_v20, %v2890_v2  ;;  %2919 = vtanh.f32 %v1081_v17  ;;  %v1085_v29 = vadd.f32 %v1084_v23, %v3347_v37 }
 0x1ff   : > { %v2902_v28 = vpop.eup %2901  ;;  %v1174_v24 = vadd.f32 %v1173_v25, %v3347_v37  ;;  %v1086_v30 = vpop.f32.mrb[27].mxu0  ;;  %2717 = vmatprep.subr.bf16.mxu0 %v2716_v21  ;;  %2921 = vtanh.f32 %v1170_v18 }
 0x200   : > { %v1175_v31 = vpop.f32.mrb[27].mxu1  ;;  %v2904_v32 = vpop.eup %2903  ;;  %v1087_v27 = vadd.f32 %v1086_v30, %v3347_v37  ;;  %2725 = vmatprep.subr.bf16.mxu1 %v2724_v26  ;;  %2719 = vmatpush1.bf16.msra.mxu0 %v2718_v15  ;;  %2923 = vtanh.f32 %v1085_v29 }
 0x201   : > { %v1176_v35 = vadd.f32 %v1175_v31, %v3347_v37  ;;  %v2906_v36 = vpop.eup %2905  ;;  %2727 = vmatpush1.bf16.msra.mxu1 %v2726_v19  ;;  %2925 = vtanh.f32 %v1174_v24  ;;  %v1090_v39 = vpop.f32.mrb[28].mxu0  ;;  %v1713_v24 = vand.u32 2139095040, %v3167_v7 }
 0x202   : > { %v2908_v38 = vpop.eup %2907  ;;  %v1179_v40 = vpop.f32.mrb[28].mxu1  ;;  %2927 = vtanh.f32 %v1087_v27  ;;  %v1091_v42 = vadd.f32 %v1090_v39, %v3353_v45 }
 0x203   : > { %v2910_v41 = vpop.eup %2909  ;;  %v1180_v34 = vadd.f32 %v1179_v40, %v3353_v45  ;;  %v1092_v43 = vpop.f32.mrb[29].mxu0  ;;  %v2722_v46 = vpack.c.bf16 %v2908_v38, %v2900_v22  ;;  %2929 = vtanh.f32 %v1176_v35  ;;  %v1714_v31 = vshrl.u32 %v1713_v24, 23 }
 0x204   : > { %v1181_v44 = vpop.f32.mrb[29].mxu1  ;;  %v2912_v47 = vpop.eup %2911  ;;  %v1093_v37 = vadd.f32 %v1092_v43, %v3353_v45  ;;  %v2730_v49 = vpack.c.bf16 %v2910_v41, %v2902_v28  ;;  %2931 = vtanh.f32 %v1091_v42  ;;  %v3033_v38 = vmov 2102212464  }
 0x205   : > { %v1182_v48 = vadd.f32 %v1181_v44, %v3353_v45  ;;  %v2914_v50 = vpop.eup %2913  ;;  %v2720_v52 = vpack.c.bf16 %v2912_v47, %v2904_v32  ;;  %2933 = vtanh.f32 %v1180_v34  ;;  %v1096_v53 = vpop.f32.mrb[30].mxu0  ;;  %v2646_v27 = vadd.s32 4294967169, %v1714_v31 }
 0x206   : > { %v1185_v54 = vpop.f32.mrb[30].mxu1  ;;  %v2728_v56 = vpack.c.bf16 %v2914_v50, %v2906_v36  ;;  %v2916_v57 = vpop.eup %2915  ;;  %2935 = vtanh.f32 %v1093_v37  ;;  %v1097_v58 = vadd.f32 %v1096_v53, %v3359_v55  ;;  %v3034_v40 = vmov 920167782  }
 0x207   : > { %v1186_v33 = vadd.f32 %v1185_v54, %v3359_v55  ;;  %v1098_v59 = vpop.f32.mrb[31].mxu0  ;;  %v1187_v60 = vpop.f32.mrb[31].mxu1  ;;  %2721 = vmatprep.subr.bf16.mxu0 %v2720_v52  ;;  %2937 = vtanh.f32 %v1182_v48  ;;  %v1720_v36 = vadd.s32 1, %v2646_v27  ;;  %v1606_v42 = vand.u32 2147483647, %v3164_v6 }
 0x208   : > { %v2918_v61 = vpop.eup %2917  ;;  %v1099_v45 = vadd.f32 %v1098_v59, %v3359_v55  ;;  %v1188_v62 = vadd.f32 %v1187_v60, %v3359_v55  ;;  %2729 = vmatprep.subr.bf16.mxu1 %v2728_v56  ;;  %2723 = vmatpush1.bf16.msra.mxu0 %v2722_v46  ;;  %2939 = vtanh.f32 %v1097_v58  ;;  %v3035_v43 = vmov 683565275  }
 0x209   : > { %v2920_v1 = vpop.eup %2919  ;;  %2731 = vmatpush1.bf16.msra.mxu1 %v2730_v49  ;;  %2941 = vtanh.f32 %v1186_v33  ;;  %vm1721_vm4 = vcmp.gt.s32.totalorder %v1720_v36, 0  ;;  %v3036_v46 = vmov 2475754826   ;;  %v3037_v48 = vmov 1326507024  }
 0x20a   : > { %v2922_v51 = vpop.eup %2921  ;;  %2943 = vtanh.f32 %v1099_v45  ;;  %v3038_v52 = vmov 2131351028   ;;  %v1722_v58 = vsel %vm1721_vm4, %v1720_v36, 0  ;;  %v1817_v33 = vand.u32 2139095040, %v3170_v8 }
 0x20b   : > { %v2924_v2 = vpop.eup %2923  ;;  %2634 = vmatmul.mubr.msk.f32.vlgmr.msra.gmra.mrb[32].mxu0 %vm821_vm2, %v1222_v63  ;;  %2945 = vtanh.f32 %v1188_v62  ;;  %v1613_v59 = vand.u32 8388607, %v1606_v42 }
 0x20c   : > { %v2926_v3 = vpop.eup %2925  ;;  %2635 = vmatmul.mubr.msk.f32.vlgmr.msra.gmra.mrb[32].mxu1 %vm821_vm2, %v1222_v63  ;;  %v2734_v55 = vpack.c.bf16 %v2924_v2, %v2916_v57  ;;  %1434 = vmatprep.mubr.f32.mxu0 %v3031_v0 }
 0x20d   : > { %v2928_v4 = vpop.eup %2927  ;;  %v2742_v5 = vpack.c.bf16 %v2926_v3, %v2918_v61  ;;  %1505 = vmatprep.mubr.f32.mxu1 %v3031_v0  ;;  %v1609_v0 = vand.u32 2139095040, %v3164_v6  ;;  %v1614_v2 = vor.u32 8388608, %v1613_v59  ;;  %v1921_v3 = vand.u32 2139095040, %v3177_v11 }
 0x20e   : > { %v2930_v9 = vpop.eup %2929  ;;  %v2732_v10 = vpack.c.bf16 %v2928_v4, %v2920_v1 }
 0x20f   : > { %v2932_v12 = vpop.eup %2931  ;;  %v2740_v13 = vpack.c.bf16 %v2930_v9, %v2922_v51  ;;  %v1610_v26 = vshrl.u32 %v1609_v0, 23  ;;  %v1818_v51 = vshrl.u32 %v1817_v33, 23 }
 0x210   : > { %v2934_v14 = vpop.eup %2933  ;;  %2733 = vmatprep.subr.bf16.mxu0 %v2732_v10 }
 0x211   : > { %v2936_v15 = vpop.eup %2935  ;;  %2741 = vmatprep.subr.bf16.mxu1 %v2740_v13  ;;  %2735 = vmatpush1.bf16.msra.mxu0 %v2734_v55  ;;  %v2642_v28 = vadd.s32 4294967169, %v1610_v26  ;;  %v2650_v9 = vadd.s32 4294967169, %v1818_v51  ;;  %v3432_v13 = vshll.u32 %v1614_v2, 8 }
 0x212   : > { %v2938_v16 = vpop.eup %2937  ;;  %2743 = vmatpush1.bf16.msra.mxu1 %v2742_v5 }
 0x213   : > { %v2940_v17 = vpop.eup %2939  ;;  %v1616_v29 = vadd.s32 1, %v2642_v28 }
 0x214   : > { %v2942_v18 = vpop.eup %2941  ;;  %v2738_v19 = vpack.c.bf16 %v2940_v17, %v2932_v12 }
 0x215   : > { %v2944_v20 = vpop.eup %2943  ;;  %v2746_v21 = vpack.c.bf16 %v2942_v18, %v2934_v14  ;;  %vm1617_vm3 = vcmp.gt.s32.totalorder %v1616_v29, 0  ;;  %v1710_v14 = vand.u32 2147483647, %v3167_v7 }
 0x216   : > { %v2946_v22 = vpop.eup %2945  ;;  %v2736_v23 = vpack.c.bf16 %v2944_v20, %v2936_v15  ;;  %v1618_v30 = vsel %vm1617_vm3, %v1616_v29, 0  ;;  %v1922_v15 = vshrl.u32 %v1921_v3, 23 }
 0x217   : > { %v2744_v25 = vpack.c.bf16 %v2946_v22, %v2938_v16  ;;  %v1620_v32 = vand.u32 31, %v1618_v30  ;;  %v3398_v34 = vshrl.u32 %v1618_v30, 5  ;;  %v3437_v16 = vshrl.u32 %v1722_v58, 5 }
 0x218   : > { %2737 = vmatprep.subr.bf16.mxu0 %v2736_v23  ;;  %v1824_v23 = vadd.s32 1, %v2650_v9  ;;  %v2654_v31 = vadd.s32 4294967169, %v1922_v15 }
 0x219   : > { %2745 = vmatprep.subr.bf16.mxu1 %v2744_v25  ;;  %2739 = vmatpush1.bf16.msra.mxu0 %v2738_v19  ;;  %v3392_v35 = vsub.s32 32, %v1620_v32  ;;  %v1632_v39 = vshll.u32 %v3033_v38, %v1620_v32  ;;  %v1623_v44 = vshll.u32 %v3035_v43, %v1620_v32  ;;  %v1635_v37 = vshll.u32 %v3034_v40, %v1620_v32 }
 0x21a   : > { %2747 = vmatpush1.bf16.msra.mxu1 %v2746_v21  ;;  %v1626_v50 = vshll.u32 %v3036_v46, %v1620_v32  ;;  %v1629_v54 = vshll.u32 %v3038_v52, %v1620_v32  ;;  %vm1641_vm5 = vcmp.lt.s32.totalorder %v3398_v34, 4  ;;  %vm1638_vm6 = vcmp.lt.s32.totalorder %v3398_v34, 1 }
 0x21b   : > { %v1633_v41 = vshrl.u32 %v3034_v40, %v3392_v35  ;;  %v1624_v47 = vshrl.u32 %v3036_v46, %v3392_v35  ;;  %v1636_v49 = vshrl.u32 %v3037_v48, %v3392_v35  ;;  %v1627_v53 = vshrl.u32 %v3038_v52, %v3392_v35 }
 0x21c   : > { %2636 = vmatmul.mubr.msk.f32.vlgmr.msra.gmra.mrb[34].mxu0 %vm821_vm2, %v1222_v63  ;;  %v1630_v56 = vshrl.u32 %v3033_v38, %v3392_v35  ;;  %vm1640_vm7 = vcmp.lt.s32.totalorder %v3398_v34, 3  ;;  %vm1639_vm8 = vcmp.lt.s32.totalorder %v3398_v34, 2  ;;  %vm1745_vm9 = vcmp.lt.s32.totalorder %v3437_v16, 4 }
 0x21d   : > { %2637 = vmatmul.mubr.msk.f32.vlgmr.msra.gmra.mrb[34].mxu1 %vm821_vm2, %v1222_v63  ;;  %v1634_v57 = vor.u32 %v1633_v41, %v1632_v39  ;;  %v1637_v60 = vor.u32 %v1636_v49, %v1635_v37  ;;  %v1625_v61 = vor.u32 %v1624_v47, %v1623_v44  ;;  %v1628_v45 = vor.u32 %v1627_v53, %v1626_v50 }
 0x21e   : > { %v1631_v62 = vor.u32 %v1630_v56, %v1629_v54  ;;  %v1724_v63 = vand.u32 31, %v1722_v58  ;;  %v1717_v39 = vand.u32 8388607, %v1710_v14  ;;  %vm1825_vm10 = vcmp.gt.s32.totalorder %v1824_v23, 0 }
 0x21f   : > { %v1647_v1 = vsel %vm1641_vm5, %v1634_v57, 920167782  ;;  %v1651_v8 = vsel %vm1641_vm5, %v1637_v60, 1326507024  ;;  %v1646_v55 = vsel %vm1638_vm6, %v1625_v61, %v1628_v45  ;;  %v1622_v44 = vshrl.u32 %v3035_v43, %v3392_v35 }
 0x220   : > { %v1648_v4 = vsel %vm1640_vm7, %v1631_v62, %v1647_v1  ;;  %v1725_v5 = vsub.s32 32, %v1724_v63  ;;  %v1650_v10 = vsel %vm1638_vm6, %v1628_v45, %v1631_v62  ;;  %v1652_v12 = vsel %vm1640_vm7, %v1634_v57, %v1651_v8 }
 0x221   : > { %v1649_v11 = vsel %vm1639_vm8, %v1646_v55, %v1648_v4  ;;  %v1727_v17 = vshll.u32 %v3035_v43, %v1724_v63  ;;  %v1739_v18 = vshll.u32 %v3034_v40, %v1724_v63  ;;  %v1653_v20 = vsel %vm1639_vm8, %v1650_v10, %v1652_v12  ;;  %v3499_v55 = vld [vmem:[%s3161_s18 + $0x10] sm:$0x77] }
 0x222   : > { %v1740_v19 = vshrl.u32 %v3037_v48, %v1725_v5  ;;  %v1736_v21 = vshll.u32 %v3033_v38, %v1724_v63  ;;  %v1737_v22 = vshrl.u32 %v3034_v40, %v1725_v5  ;;  %v1728_v26 = vshrl.u32 %v3036_v46, %v1725_v5 }
 0x223   : > { %v3447_v25 = vmul.u32.u64.low %v3432_v13, %v1649_v11  ;;  %v3448_v0 = vmul.u32.u64.high %v3432_v13, %v1649_v11, %v3447_v25  ;;  %v1730_v28 = vshll.u32 %v3036_v46, %v1724_v63  ;;  %v1731_v29 = vshrl.u32 %v3038_v52, %v1725_v5 }
 0x224   : > { %v1733_v24 = vshll.u32 %v3038_v52, %v1724_v63  ;;  %v1734_v30 = vshrl.u32 %v3033_v38, %v1725_v5  ;;  %v3457_v32 = vmul.u32.u64.low %v3432_v13, %v1653_v20  ;;  %v3458_v27 = vmul.u32.u64.high %v3432_v13, %v1653_v20, %v3457_v32 }
 0x225   : > { %v1741_v36 = vor.u32 %v1740_v19, %v1739_v18  ;;  %v1738_v41 = vor.u32 %v1737_v22, %v1736_v21  ;;  %v1643_v47 = vsel %vm1641_vm5, %v1631_v62, 2102212464  ;;  %v1729_v37 = vor.u32 %v1728_v26, %v1727_v17  ;;  %v3517_v19 = vld [vmem:[%s3161_s18 + $0x18] sm:$0x77] }
 0x226   : > { %v1732_v49 = vor.u32 %v1731_v29, %v1730_v28  ;;  %v1735_v50 = vor.u32 %v1734_v30, %v1733_v24  ;;  %v1928_v53 = vadd.s32 1, %v2654_v31  ;;  %vm1742_vm11 = vcmp.lt.s32.totalorder %v3437_v16, 1 }
 0x227   : > { %vm1744_vm12 = vcmp.lt.s32.totalorder %v3437_v16, 3  ;;  %v1755_v54 = vsel %vm1745_vm9, %v1741_v36, 1326507024  ;;  %v1826_v56 = vsel %vm1825_vm10, %v1824_v23, 0  ;;  %v1718_v57 = vor.u32 8388608, %v1717_v39 }
 0x228   : > { %v1751_v58 = vsel %vm1745_vm9, %v1738_v41, 920167782  ;;  %v1642_v35 = vsel %vm1638_vm6, %v1622_v44, %v1625_v61  ;;  %v1644_v33 = vsel %vm1640_vm7, %v1628_v45, %v1643_v47  ;;  %vm1743_vm13 = vcmp.lt.s32.totalorder %v3437_v16, 2 }
 0x229   : > { %v1754_v59 = vsel %vm1742_vm11, %v1732_v49, %v1735_v50  ;;  %v1756_v60 = vsel %vm1744_vm12, %v1738_v41, %v1755_v54  ;;  %v1828_v62 = vand.u32 31, %v1826_v56  ;;  %vm1929_vm14 = vcmp.gt.s32.totalorder %v1928_v53, 0 }
 0x22a   : > { %v1664_v63 = vadd.s32 1, %v3448_v0  ;;  %v1726_v1 = vshrl.u32 %v3035_v43, %v1725_v5  ;;  %v1750_v61 = vsel %vm1742_vm11, %v1729_v37, %v1732_v49  ;;  %v1752_v45 = vsel %vm1744_vm12, %v1735_v50, %v1751_v58 }
 0x22b   : > { %v1645_v51 = vsel %vm1639_vm8, %v1642_v35, %v1644_v33  ;;  %vm1663_vm15 = vc.u32 %v3458_v27, %v3447_v25  ;;  %v1747_v2 = vsel %vm1745_vm9, %v1735_v50, 2102212464  ;;  %v3494_v8 = vshll.u32 %v1718_v57, 8 }
 0x22c   : > { %v1757_v3 = vsel %vm1743_vm13, %v1754_v59, %v1756_v60  ;;  %v1814_v4 = vand.u32 2147483647, %v3499_v55  ;;  %v1930_v5 = vsel %vm1929_vm14, %v1928_v53, 0  ;;  %v1753_v34 = vsel %vm1743_vm13, %v1750_v61, %v1752_v45 }
 0x22d   : > { %v3504_v9 = vsub.s32 32, %v1828_v62  ;;  %v1661_v10 = vmul.u32 %v3432_v13, %v1645_v51  ;;  %v1665_v12 = vsel %vm1663_vm15, %v1664_v63, %v3448_v0  ;;  %v1746_v11 = vsel %vm1742_vm11, %v1726_v1, %v1729_v37 }
 0x22e   : > { %v1748_v15 = vsel %vm1744_vm12, %v1732_v49, %v1747_v2  ;;  %v3513_v17 = vmul.u32.u64.low %v3494_v8, %v1757_v3  ;;  %v3514_v18 = vmul.u32.u64.high %v3494_v8, %v1757_v3, %v3513_v17  ;;  %v1918_v20 = vand.u32 2147483647, %v3517_v19 }
 0x22f   : > { %v1932_v21 = vand.u32 31, %v1930_v5  ;;  %v3521_v22 = vmul.u32.u64.low %v3494_v8, %v1753_v34  ;;  %v3522_v13 = vmul.u32.u64.high %v3494_v8, %v1753_v34, %v3521_v22  ;;  %v1821_v23 = vand.u32 8388607, %v1814_v4 }
 0x230   : > { %v3527_v0 = vshrl.u32 %v1826_v56, 5  ;;  %v1831_v26 = vshll.u32 %v3035_v43, %v1828_v62  ;;  %v1832_v28 = vshrl.u32 %v3036_v46, %v3504_v9  ;;  %v1840_v29 = vshll.u32 %v3033_v38, %v1828_v62 }
 0x231   : > { %v1841_v24 = vshrl.u32 %v3034_v40, %v3504_v9  ;;  %v1834_v30 = vshll.u32 %v3036_v46, %v1828_v62  ;;  %v1835_v31 = vshrl.u32 %v3038_v52, %v3504_v9  ;;  %v1837_v32 = vshll.u32 %v3038_v52, %v1828_v62 }
 0x232   : > { %v1838_v36 = vshrl.u32 %v3033_v38, %v3504_v9  ;;  %v1843_v39 = vshll.u32 %v3034_v40, %v1828_v62  ;;  %v1844_v41 = vshrl.u32 %v3037_v48, %v3504_v9  ;;  %v3544_v44 = vsub.s32 32, %v1932_v21 }
 0x233   : > { %v3546_v47 = vadd.s32 %v1665_v12, %v1661_v10  ;;  %v1749_v37 = vsel %vm1743_vm13, %v1746_v11, %v1748_v15  ;;  %v1822_v49 = vor.u32 8388608, %v1821_v23  ;;  %v3550_v50 = vor.u32 %v1832_v28, %v1831_v26 }
 0x234   : > { %v1842_v53 = vor.u32 %v1841_v24, %v1840_v29  ;;  %v1925_v54 = vand.u32 8388607, %v1918_v20  ;;  %v3554_v56 = vor.u32 %v1835_v31, %v1834_v30  ;;  %v1839_v57 = vor.u32 %v1838_v36, %v1837_v32 }
 0x235   : > { %vm1846_vm0 = vcmp.lt.s32.totalorder %v3527_v0, 1  ;;  %vm1849_vm1 = vcmp.lt.s32.totalorder %v3527_v0, 4  ;;  %v1845_v58 = vor.u32 %v1844_v41, %v1843_v39  ;;  %v3558_v35 = vshrl.u32 %v1930_v5, 5 }
 0x236   : > { %v1944_v16 = vshll.u32 %v3033_v38, %v1932_v21  ;;  %v1945_v33 = vshrl.u32 %v3034_v40, %v3544_v44  ;;  %v1935_v59 = vshll.u32 %v3035_v43, %v1932_v21  ;;  %v1936_v60 = vshrl.u32 %v3036_v46, %v3544_v44 }
 0x237   : > { %v1938_v62 = vshll.u32 %v3036_v46, %v1932_v21  ;;  %v1939_v63 = vshrl.u32 %v3038_v52, %v3544_v44  ;;  %vm1767_vm2 = vc.u32 %v3514_v18, %v3521_v22  ;;  %v1768_v1 = vadd.s32 1, %v3522_v13 }
 0x238   : > { %vm1848_vm3 = vcmp.lt.s32.totalorder %v3527_v0, 3  ;;  %v1855_v61 = vsel %vm1849_vm1, %v1842_v53, 920167782  ;;  %vm1847_vm4 = vcmp.lt.s32.totalorder %v3527_v0, 2  ;;  %v1854_v46 = vsel %vm1846_vm0, %v3550_v50, %v3554_v56 }
 0x239   : > { %v1941_v45 = vshll.u32 %v3038_v52, %v1932_v21  ;;  %v1942_v51 = vshrl.u32 %v3033_v38, %v3544_v44  ;;  %v1859_v2 = vsel %vm1849_vm1, %v1845_v58, 1326507024  ;;  %v1946_v3 = vor.u32 %v1945_v33, %v1944_v16 }
 0x23a   : > { %v1947_v5 = vshll.u32 %v3034_v40, %v1932_v21  ;;  %v1948_v34 = vshrl.u32 %v3037_v48, %v3544_v44  ;;  %v1856_v10 = vsel %vm1848_vm3, %v1839_v57, %v1855_v61  ;;  %v1937_v12 = vor.u32 %v1936_v60, %v1935_v59 }
 0x23b   : > { %v1940_v11 = vor.u32 %v1939_v63, %v1938_v62  ;;  %vm1953_vm5 = vcmp.lt.s32.totalorder %v3558_v35, 4  ;;  %v1765_v52 = vmul.u32 %v3494_v8, %v1749_v37  ;;  %v1862_v15 = vshll.u32 %v1822_v49, 8 }
 0x23c   : > { %v1926_v38 = vor.u32 8388608, %v1925_v54  ;;  %vm1950_vm6 = vcmp.lt.s32.totalorder %v3558_v35, 1  ;;  %v1769_v40 = vsel %vm1767_vm2, %v1768_v1, %v3522_v13  ;;  %v1858_v48 = vsel %vm1846_vm0, %v3554_v56, %v1839_v57 }
 0x23d   : > { %v1860_v17 = vsel %vm1848_vm3, %v1842_v53, %v1859_v2  ;;  %v1943_v21 = vor.u32 %v1942_v51, %v1941_v45  ;;  %v1857_v8 = vsel %vm1847_vm4, %v1854_v46, %v1856_v10  ;;  %v1949_v23 = vor.u32 %v1948_v34, %v1947_v5 }
 0x23e   : > { %vm1952_vm7 = vcmp.lt.s32.totalorder %v3558_v35, 3  ;;  %v1959_v26 = vsel %vm1953_vm5, %v1946_v3, 920167782  ;;  %v1667_v28 = vadd.s32 536870912, %v3546_v47  ;;  %vm1951_vm8 = vcmp.lt.s32.totalorder %v3558_v35, 2 }
 0x23f   : > { %v1958_v13 = vsel %vm1950_vm6, %v1937_v12, %v1940_v11  ;;  %v1861_v29 = vsel %vm1847_vm4, %v1858_v48, %v1860_v17  ;;  %v1966_v24 = vshll.u32 %v1926_v38, 8  ;;  %v1770_v30 = vadd.s32 %v1769_v40, %v1765_v52 }
 0x240   : > { %v3613_v31 = vmul.u32.u64.low %v1862_v15, %v1857_v8  ;;  %v3614_v32 = vmul.u32.u64.high %v1862_v15, %v1857_v8, %v3613_v31  ;;  %v1960_v36 = vsel %vm1952_vm7, %v1943_v21, %v1959_v26  ;;  %v1962_v41 = vsel %vm1950_vm6, %v1940_v11, %v1943_v21 }
 0x241   : > { %v1961_v39 = vsel %vm1951_vm8, %v1958_v13, %v1960_v36  ;;  %v1963_v37 = vsel %vm1953_vm5, %v1949_v23, 1326507024  ;;  %v3625_v49 = vshrl.u32 %v1667_v28, 30  ;;  %v1830_v53 = vshrl.u32 %v3035_v43, %v3504_v9 }
 0x242   : > { %v3629_v54 = vmul.u32.u64.low %v1862_v15, %v1861_v29  ;;  %v3630_v58 = vmul.u32.u64.high %v1862_v15, %v1861_v29, %v3629_v54  ;;  %v1851_v16 = vsel %vm1849_vm1, %v1839_v57, 2102212464  ;;  %v1964_v33 = vsel %vm1952_vm7, %v1946_v3, %v1963_v37 }
 0x243   : > { %v3636_v59 = vmul.u32.u64.low %v1966_v24, %v1961_v39  ;;  %v3637_v60 = vmul.u32.u64.high %v1966_v24, %v1961_v39, %v3636_v59  ;;  %v1771_v62 = vadd.s32 536870912, %v1770_v30  ;;  %v1934_v63 = vshrl.u32 %v3035_v43, %v3544_v44 }
 0x244   : > { %v1965_v9 = vsel %vm1951_vm8, %v1962_v41, %v1964_v33  ;;  %v1955_v1 = vsel %vm1953_vm5, %v1943_v21, 2102212464  ;;  %v1850_v57 = vsel %vm1846_vm0, %v1830_v53, %v3550_v50  ;;  %v1852_v45 = vsel %vm1848_vm3, %v3554_v56, %v1851_v16 }
 0x245   : > { %v3646_v61 = vmul.u32.u64.low %v1966_v24, %v1965_v9  ;;  %v3647_v46 = vmul.u32.u64.high %v1966_v24, %v1965_v9, %v3646_v61  ;;  %v1669_v51 = vshll.u32 %v3625_v49, 30  ;;  %v3656_v43 = vshrl.u32 %v1771_v62, 30 }
 0x246   : > { %v1954_v44 = vsel %vm1950_vm6, %v1934_v63, %v1937_v12  ;;  %v1956_v2 = vsel %vm1952_vm7, %v1940_v11, %v1955_v1  ;;  %v1853_v3 = vsel %vm1847_vm4, %v1850_v57, %v1852_v45  ;;  %v1872_v5 = vadd.s32 1, %v3614_v32 }
 0x247   : > { %vm1871_vm9 = vc.u32 %v3630_v58, %v3613_v31  ;;  %v1670_v50 = vsub.s32 %v3546_v47, %v1669_v51  ;;  %v1957_v56 = vsel %vm1951_vm8, %v1954_v44, %v1956_v2  ;;  %v1976_v34 = vadd.s32 1, %v3637_v60 }
 0x248   : > { %v1773_v10 = vshll.u32 %v3656_v43, 30  ;;  %v1869_v12 = vmul.u32 %v1862_v15, %v1853_v3  ;;  %vm1975_vm10 = vc.u32 %v3647_v46, %v3636_v59  ;;  %v1873_v0 = vsel %vm1871_vm9, %v1872_v5, %v3614_v32 }
 0x249   : > { %v1973_v11 = vmul.u32 %v1966_v24, %v1957_v56  ;;  %v1672_v52 = vsub.s32 0, %v1670_v50  ;;  %v1977_v38 = vsel %vm1975_vm10, %v1976_v34, %v3637_v60  ;;  %v1662_v60 = vadd.s32 %v3447_v25, %v3458_v27 }
 0x24a   : > { %v1774_v40 = vsub.s32 %v1770_v30, %v1773_v10  ;;  %v1874_v48 = vadd.s32 %v1873_v0, %v1869_v12  ;;  %v1766_v44 = vadd.s32 %v3521_v22, %v3514_v18  ;;  %vm3704_vm0 = vcmp.le.f32.partialorder %v1606_v42, 0.7853982 }
 0x24b   : > { %v1978_v47 = vadd.s32 %v1977_v38, %v1973_v11  ;;  %v2643_v17 = vmin.u32 %v1672_v52, %v1670_v50  ;;  %vm3721_vm2 = vcmp.le.f32.partialorder %v1710_v14, 0.7853982  ;;  %v1796_v14 = vsub.s32 4, %v3656_v43 }
 0x24c   : > { %v1776_v35 = vsub.s32 0, %v1774_v40  ;;  %v1875_v21 = vadd.s32 536870912, %v1874_v48  ;;  %vm1816_vm3 = vcmp.lt.s32.totalorder %v3499_v55, 0  ;;  %vm1920_vm4 = vcmp.lt.s32.totalorder %v3517_v19, 0 }
 0x24d   : > { %v1979_v8 = vadd.s32 536870912, %v1978_v47  ;;  %v1674_v23 = vclz %v2643_v17  ;;  %vm3761_vm7 = vcmp.le.f32.partialorder %v1814_v4, 0.7853982  ;;  %vm3772_vm9 = vcmp.le.f32.partialorder %v1918_v20, 0.7853982 }
 0x24e   : > { %v2647_v26 = vmin.u32 %v1776_v35, %v1774_v40  ;;  %v3676_v28 = vshrl.u32 %v1875_v21, 30 }
 0x24f   : > { %v3678_v15 = vshrl.u32 %v1979_v8, 30  ;;  %v2644_v13 = vadd.s32 4294967294, %v1674_v23  ;;  %v3695_v8 = vld [vmem:[%s3161_s18] sm:$0x77] }
 0x250   : > { %v1778_v29 = vclz %v2647_v26  ;;  %v1877_v24 = vshll.u32 %v3676_v28, 30  ;;  %vm1608_vm15 = vcmp.lt.s32.totalorder %v3695_v8, 0  ;;  %v1870_v26 = vadd.s32 %v3613_v31, %v3630_v58 }
 0x251   : > { %v1981_v32 = vshll.u32 %v3678_v15, 30  ;;  %vm2645_vm11 = vcmp.lt.s32.totalorder %v2644_v13, 0 }
 0x252   : > { %v2648_v30 = vadd.s32 4294967294, %v1778_v29  ;;  %v3682_v36 = vsub.s32 %v1874_v48, %v1877_v24  ;;  %v1677_v39 = vsel %vm2645_vm11, 0, %v2644_v13  ;;  %v1974_v24 = vadd.s32 %v3636_v59, %v3647_v46  ;;  %v3712_v59 = vld [vmem:[%s3161_s18 + $0x8] sm:$0x77]  ;;  %s3794_s18 = sld [smem:[#allocation2]] }
 0x253   : > { %v3684_v41 = vsub.s32 %v1978_v47, %v1981_v32  ;;  %v1682_v53 = vsub.s32 4294967266, %v1677_v39  ;;  %v1678_v62 = vsub.s32 32, %v1677_v39  ;;  %v1679_v57 = vshll.u32 %v1670_v50, %v1677_v39 }
 0x254   : > { %vm2649_vm12 = vcmp.lt.s32.totalorder %v2648_v30, 0  ;;  %v1880_v37 = vsub.s32 0, %v3682_v36  ;;  %vm1712_vm1 = vcmp.lt.s32.totalorder %v3712_v59, 0 }
 0x255   : > { %v1984_v54 = vsub.s32 0, %v3684_v41  ;;  %v1781_v16 = vsel %vm2649_vm12, 0, %v2648_v30  ;;  %v1683_v63 = vadd.s32 127, %v1682_v53  ;;  %v1680_v45 = vshrl.u32 %v1662_v60, %v1678_v62 }
 0x256   : > { %v2651_v33 = vmin.u32 %v1880_v37, %v3682_v36  ;;  %v1786_v9 = vsub.s32 4294967266, %v1781_v16  ;;  %v1782_v2 = vsub.s32 32, %v1781_v16  ;;  %v1783_v12 = vshll.u32 %v1774_v40, %v1781_v16 }
 0x257   : > { %v2655_v1 = vmin.u32 %v1984_v54, %v3684_v41  ;;  %v1684_v51 = vshll.u32 %v1683_v63, 23  ;;  %v1681_v34 = vor.u32 %v1680_v45, %v1679_v57  ;;  %v3039_v16 = vmov 839922192  }
 0x258   : > { %v1882_v61 = vclz %v2651_v33  ;;  %v1787_v3 = vadd.s32 127, %v1786_v9  ;;  %v1784_v25 = vshrl.u32 %v1766_v44, %v1782_v2  ;;  %v1518_v33 = vunpack.c.l.s4 %v3039_v16 }
 0x259   : > { %v1986_v5 = vclz %v2655_v1  ;;  %v1685_v10 = vor.u32 4788187, %v1684_v51  ;;  %v1688_v52 = vcvt.s32.f32 %v1681_v34  ;;  %v1520_v60 = vlaneseq  ;;  %v1516_v34 = vpop.permute.xlu0 %1515 }
 0x25a   : > { %v2652_v56 = vadd.s32 4294967294, %v1882_v61  ;;  %v1788_v27 = vshll.u32 %v1787_v3, 23  ;;  %v1785_v50 = vor.u32 %v1784_v25, %v1783_v12  ;;  %v1519_v61 = vunpack.c.0.s8 %v1518_v33 }
 0x25b   : > { %v2656_v0 = vadd.s32 4294967294, %v1986_v5  ;;  %v1686_v11 = vand.u32 2147483647, %v1685_v10  ;;  %v3727_v57 = vshrl.u32 %v1520_v60, 7  ;;  %v1692_v45 = vsub.s32 4, %v3625_v49 }
 0x25c   : > { %vm2653_vm13 = vcmp.lt.s32.totalorder %v2652_v56, 0  ;;  %v1789_v38 = vor.u32 4788187, %v1788_v27  ;;  %v1792_v17 = vcvt.s32.f32 %v1785_v50  ;;  %v1797_v27 = vsel %vm1712_vm1, %v1796_v14, %v3656_v43 }
 0x25d   : > { %vm2657_vm14 = vcmp.lt.s32.totalorder %v2656_v0, 0  ;;  %v1885_v48 = vsel %vm2653_vm13, 0, %v2652_v56  ;;  %v1689_v47 = vmul.f32 %v1688_v52, %v1686_v11  ;;  %v1522_v3 = vsub.s32 %v1519_v61, %v3727_v57  ;;  %v1533_v56 = vpop.permute.xlu1 %1532 }
 0x25e   : > { %v1989_v18 = vsel %vm2657_vm14, 0, %v2656_v0  ;;  %v1790_v22 = vand.u32 2147483647, %v1789_v38  ;;  %v1890_v35 = vsub.s32 4294967266, %v1885_v48  ;;  %v1886_v13 = vsub.s32 32, %v1885_v48 }
 0x25f   : > { %v1994_v21 = vsub.s32 4294967266, %v1989_v18  ;;  %v1690_v40 = vxor.u32 2147483648, %v1689_v47  ;;  %v1990_v32 = vsub.s32 32, %v1989_v18  ;;  %v1887_v54 = vshll.u32 %v3682_v36, %v1885_v48 }
 0x260   : > { %v1793_v23 = vmul.f32 %v1792_v17, %v1790_v22  ;;  %v1891_v29 = vadd.s32 127, %v1890_v35  ;;  %v1888_v31 = vshrl.u32 %v1870_v26, %v1886_v13  ;;  %v1991_v42 = vshll.u32 %v3684_v41, %v1989_v18 }
 0x261   : > { %v1995_v30 = vadd.s32 127, %v1994_v21  ;;  %v1691_v37 = vsel %vm1608_vm15, %v1690_v40, %v1689_v47  ;;  %v1992_v46 = vshrl.u32 %v1974_v24, %v1990_v32  ;;  %v1693_v5 = vsel %vm1608_vm15, %v1692_v45, %v3625_v49 }
 0x262   : > { %v1794_v53 = vxor.u32 2147483648, %v1793_v23  ;;  %v1892_v58 = vshll.u32 %v1891_v29, 23  ;;  %v1694_v6 = vsel %vm3704_vm0, %v3695_v8, %v1691_v37  ;;  %v1889_v9 = vor.u32 %v1888_v31, %v1887_v54 }
 0x263   : > { %v1996_v62 = vshll.u32 %v1995_v30, 23  ;;  %2947 = vcosq.f32 %v1694_v6  ;;  %v1993_v41 = vor.u32 %v1992_v46, %v1991_v42  ;;  %v1695_v25 = vsel %vm3704_vm0, 0, %v1693_v5 }
 0x264   : > { %v1795_v63 = vsel %vm1712_vm1, %v1794_v53, %v1793_v23  ;;  %v1893_v1 = vor.u32 4788187, %v1892_v58  ;;  %2949 = vsinq.f32 %v1694_v6  ;;  %v1896_v2 = vcvt.s32.f32 %v1889_v9 }
 0x265   : > { %v1997_v51 = vor.u32 4788187, %v1996_v62  ;;  %v1798_v7 = vsel %vm3721_vm2, %v3712_v59, %v1795_v63  ;;  %v2000_v12 = vcvt.s32.f32 %v1993_v41  ;;  %v3743_v11 = vrot.slane %v1533_v56, %v1522_v3 }
 0x266   : > { %v1894_v44 = vand.u32 2147483647, %v1893_v1  ;;  %2951 = vcosq.f32 %v1798_v7  ;;  %v3745_v52 = vrot.slane %v1516_v34, %v1522_v3  ;;  %v1699_v38 = vadd.s32 3, %v1695_v25 }
 0x267   : > { %v1998_v10 = vand.u32 2147483647, %v1997_v51  ;;  %2953 = vsinq.f32 %v1798_v7  ;;  %v1799_v48 = vsel %vm3721_vm2, 0, %v1797_v27  ;;  %v2115_v18 = vand.u32 3, %v1695_v25 }
 0x268   : > { %v1897_v0 = vmul.f32 %v1896_v2, %v1894_v44  ;;  %v1542_v17 = vsub.f32 %v3695_v8, %v3743_v11  ;;  %v1525_v43 = vsub.f32 %v3695_v8, %v3745_v52  ;;  %v1543_v35 = vsub.f32 %v3712_v59, %v3743_v11 }
 0x269   : > { %v2001_v50 = vmul.f32 %v2000_v12, %v1998_v10  ;;  %v1526_v21 = vsub.f32 %v3712_v59, %v3745_v52  ;;  %v1803_v40 = vadd.s32 3, %v1799_v48  ;;  %v1700_v26 = vand.u32 3, %v1699_v38 }
 0x26a   : > { %v1898_v22 = vxor.u32 2147483648, %v1897_v0  ;;  %vm2117_vm5 = vcmp.eq.s32.totalorder %v2115_v18, 0  ;;  %vm2120_vm6 = vcmp.eq.s32.totalorder %v2115_v18, 2  ;;  %v3040_v37 = vmov 1966171168  }
 0x26b   : > { %v2002_v23 = vxor.u32 2147483648, %v2001_v50  ;;  %v3767_v53 = vunpack.c.l.s4 %v3040_v37  ;;  %v1546_v54 = vmul.f32 %v1542_v17, %v1525_v43  ;;  %v1570_v31 = vrot.slane %v3695_v8, 6 }
 0x26c   : > { %v1899_v30 = vsel %vm1816_vm3, %v1898_v22, %v1897_v0  ;;  %v2218_v58 = vand.u32 3, %v1799_v48  ;;  %vm2116_vm8 = vcmp.lt.s32.totalorder %v2115_v18, 2  ;;  %v1547_v16 = vmul.f32 %v1543_v35, %v1526_v21 }
 0x26d   : > { %v2948_v49 = vpop.eup %2947  ;;  %v2003_v33 = vsel %vm1920_vm4, %v2002_v23, %v2001_v50  ;;  %v1804_v42 = vand.u32 3, %v1803_v40  ;;  %v1902_v46 = vsel %vm3761_vm7, %v3499_v55, %v1899_v30  ;;  %vm1702_vm10 = vcmp.eq.s32.totalorder %v1700_v26, 0 }
 0x26e   : > { %v2950_v47 = vpop.eup %2949  ;;  %v1706_v29 = vxor.u32 2147483648, %v2948_v49  ;;  %vm1705_vm11 = vcmp.eq.s32.totalorder %v1700_v26, 2  ;;  %vm2219_vm12 = vcmp.lt.s32.totalorder %v2218_v58, 2  ;;  %vm2220_vm13 = vcmp.eq.s32.totalorder %v2218_v58, 0 }
 0x26f   : > { %v1703_v13 = vxor.u32 2147483648, %v2950_v47  ;;  %vm2223_vm14 = vcmp.eq.s32.totalorder %v2218_v58, 2  ;;  %v2006_v20 = vsel %vm3772_vm9, %v3517_v19, %v2003_v33  ;;  %vm1698_vm15 = vweird.f32 %v3695_v8 }
 0x270   : > { %v2952_v24 = vpop.eup %2951  ;;  %v2122_v6 = vsel %vm2120_vm6, %v1706_v29, %v2950_v47  ;;  %v1900_v9 = vsub.s32 4, %v3676_v28  ;;  %2955 = vcosq.f32 %v1902_v46  ;;  %vm1701_vm0 = vcmp.lt.s32.totalorder %v1700_v26, 2 }
 0x271   : > { %v2954_v39 = vpop.eup %2953  ;;  %v2119_v60 = vsel %vm2117_vm5, %v2948_v49, %v1703_v13  ;;  %v1810_v36 = vxor.u32 2147483648, %v2952_v24  ;;  %v1704_v1 = vsel %vm1702_vm10, %v2948_v49, %v1703_v13  ;;  %v1707_v61 = vsel %vm1705_vm11, %v1706_v29, %v2950_v47 }
 0x272   : > { %v1807_v62 = vxor.u32 2147483648, %v2954_v39  ;;  %v2123_v63 = vsel %vm2116_vm8, %v2119_v60, %v2122_v6  ;;  %2957 = vsinq.f32 %v1902_v46  ;;  %v2004_v51 = vsub.s32 4, %v3678_v15 }
 0x273   : > { %v2225_v41 = vsel %vm2223_vm14, %v1810_v36, %v2954_v39  ;;  %2959 = vcosq.f32 %v2006_v20  ;;  %v2124_v7 = vsel %vm1698_vm15, nan, %v2123_v63  ;;  %vm1806_vm1 = vcmp.eq.s32.totalorder %v1804_v42, 0 }
 0x274   : > { %v2222_v45 = vsel %vm2220_vm13, %v2952_v24, %v1807_v62  ;;  %vm1809_vm2 = vcmp.eq.s32.totalorder %v1804_v42, 2  ;;  %2961 = vsinq.f32 %v2006_v20  ;;  %v2638_v14 = vrot.slane %v1546_v54, 9 }
 0x275   : > { %v1708_v44 = vsel %vm1701_vm0, %v1704_v1, %v1707_v61  ;;  %v1572_v2 = vrot.slane %v3712_v59, 6  ;;  %v1901_v3 = vsel %vm1816_vm3, %v1900_v9, %v3676_v28  ;;  %v2639_v5 = vrot.slane %v1547_v16, 9 }
 0x276   : > { %vm1802_vm5 = vweird.f32 %v3712_v59  ;;  %vm1805_vm6 = vcmp.lt.s32.totalorder %v1804_v42, 2  ;;  %v2226_v56 = vsel %vm2219_vm12, %v2222_v45, %v2225_v41  ;;  %v2674_v34 = vrot.slane %v2124_v7, 9 }
 0x277   : > { %v1808_v10 = vsel %vm1806_vm1, %v2952_v24, %v1807_v62  ;;  %v1811_v12 = vsel %vm1809_vm2, %v1810_v36, %v2954_v39  ;;  %v2005_v25 = vsel %vm1920_vm4, %v2004_v51, %v3678_v15  ;;  %v2468_v27 = vunpack.c.0.s8 %v3767_v53 }
 0x278   : > { %v1709_v28 = vsel %vm1698_vm15, nan, %v1708_v44  ;;  %v1903_v0 = vsel %vm3761_vm7, 0, %v1901_v3  ;;  %v1544_v50 = vsub.f32 %v3499_v55, %v3743_v11  ;;  %v1571_v49 = vrot.slane %v1570_v31, 4 }
 0x279   : > { %v1573_v38 = vrot.slane %v1572_v2, 4  ;;  %v2227_v48 = vsel %vm1802_vm5, nan, %v2226_v56  ;;  %v1527_v47 = vsub.f32 %v3499_v55, %v3745_v52  ;;  %v1566_v15 = vmul.f32 %v2638_v14, %v1546_v54 }
 0x27a   : > { %v1812_v18 = vsel %vm1805_vm6, %v1808_v10, %v1811_v12  ;;  %v2007_v8 = vsel %vm3772_vm9, 0, %v2005_v25  ;;  %v2956_v22 = vpop.eup %2955  ;;  %v2450_v17 = vmul.f32 %v2674_v34, %v1709_v28  ;;  %v1567_v43 = vmul.f32 %v2639_v5, %v1547_v16 }
 0x27b   : > { %v1907_v35 = vadd.s32 3, %v1903_v0  ;;  %v2321_v21 = vand.u32 3, %v1903_v0  ;;  %v3815_v23 = vsub.s32 %v2468_v27, %v3727_v57  ;;  %v2675_v26 = vrot.slane %v2227_v48, 9 }
 0x27c   : > { %v2958_v40 = vpop.eup %2957  ;;  %v1545_v29 = vsub.f32 %v3517_v19, %v3743_v11  ;;  %v1528_v24 = vsub.f32 %v3517_v19, %v3745_v52  ;;  %v1813_v32 = vsel %vm1802_vm5, nan, %v1812_v18  ;;  %v2011_v30 = vadd.s32 3, %v2007_v8 }
 0x27d   : > { %v2960_v13 = vpop.eup %2959  ;;  %v3824_v37 = vstv %s3794_s18  ;;  %v1582_v53 = vmul.f32 %v1571_v49, %v1566_v15  ;;  %v3826_v54 = vmul.f32 %v1544_v50, %v1527_v47  ;;  %v2424_v57 = vand.u32 3, %v2007_v8 }
 0x27e   : > { %v2962_v39 = vpop.eup %2961  ;;  %v2454_v31 = vmul.f32 %v2450_v17, %v1571_v49  ;;  %v1583_v58 = vmul.f32 %v1573_v38, %v1567_v43  ;;  %v1908_v16 = vand.u32 3, %v1907_v35  ;;  %vm2323_vm3 = vcmp.eq.s32.totalorder %v2321_v21, 0 }
 0x27f   : > { %v2451_v11 = vmul.f32 %v2675_v26, %v1813_v32  ;;  %v1911_v33 = vxor.u32 2147483648, %v2958_v40  ;;  %v1914_v60 = vxor.u32 2147483648, %v2956_v22  ;;  %vm2326_vm4 = vcmp.eq.s32.totalorder %v2321_v21, 2 }
 0x280   : > { %v2012_v42 = vand.u32 3, %v2011_v30  ;;  %v2015_v46 = vxor.u32 2147483648, %v2962_v39  ;;  %v2018_v62 = vxor.u32 2147483648, %v2960_v13  ;;  %vm2426_vm7 = vcmp.eq.s32.totalorder %v2424_v57, 0 }
 0x281   : > { %vm2429_vm8 = vcmp.eq.s32.totalorder %v2424_v57, 2  ;;  %vm1910_vm9 = vcmp.eq.s32.totalorder %v1908_v16, 0  ;;  %vm1913_vm10 = vcmp.eq.s32.totalorder %v1908_v16, 2  ;;  %vm2322_vm11 = vcmp.lt.s32.totalorder %v2321_v21, 2 }
 0x282   : > { %v2455_v61 = vmul.f32 %v2451_v11, %v1573_v38  ;;  %v2325_v45 = vsel %vm2323_vm3, %v2956_v22, %v1911_v33  ;;  %v2328_v41 = vsel %vm2326_vm4, %v1914_v60, %v2958_v40  ;;  %vm2425_vm12 = vcmp.lt.s32.totalorder %v2424_v57, 2 }
 0x283   : > { %v2428_v7 = vsel %vm2426_vm7, %v2960_v13, %v2015_v46  ;;  %v2431_v14 = vsel %vm2429_vm8, %v2018_v62, %v2962_v39  ;;  %vm1906_vm13 = vweird.f32 %v3499_v55  ;;  %vm2014_vm14 = vcmp.eq.s32.totalorder %v2012_v42, 0 }
 0x284   : > { %vm2017_vm15 = vcmp.eq.s32.totalorder %v2012_v42, 2  ;;  %vm1909_vm0 = vcmp.lt.s32.totalorder %v1908_v16, 2  ;;  %v2329_v3 = vsel %vm2322_vm11, %v2325_v45, %v2328_v41  ;;  %vm2010_vm1 = vweird.f32 %v3517_v19 }
 0x285   : > { %v1912_v56 = vsel %vm1910_vm9, %v2956_v22, %v1911_v33  ;;  %v1915_v34 = vsel %vm1913_vm10, %v1914_v60, %v2958_v40  ;;  %v2432_v10 = vsel %vm2425_vm12, %v2428_v7, %v2431_v14  ;;  %vm2013_vm2 = vcmp.lt.s32.totalorder %v2012_v42, 2 }
 0x286   : > { %v2016_v25 = vsel %vm2014_vm14, %v2960_v13, %v2015_v46  ;;  %v2019_v27 = vsel %vm2017_vm15, %v2018_v62, %v2962_v39  ;;  %v2330_v0 = vsel %vm1906_vm13, nan, %v2329_v3  ;;  %v1549_v50 = vmul.f32 %v1545_v29, %v1528_v24 }
 0x287   : > { %v1916_v38 = vsel %vm1909_vm0, %v1912_v56, %v1915_v34  ;;  %v2433_v48 = vsel %vm2010_vm1, nan, %v2432_v10  ;;  %v2020_v47 = vsel %vm2013_vm2, %v2016_v25, %v2019_v27  ;;  %v2640_v15 = vrot.slane %v3826_v54, 9 }
 0x288   : > { %v1574_v18 = vrot.slane %v3499_v55, 6  ;;  %v2676_v8 = vrot.slane %v2330_v0, 9  ;;  %v1917_v17 = vsel %vm1906_vm13, nan, %v1916_v38  ;;  %v2641_v43 = vrot.slane %v1549_v50, 9 }
 0x289   : > { %v1576_v35 = vrot.slane %v3517_v19, 6  ;;  %v2677_v21 = vrot.slane %v2433_v48, 9  ;;  %v2021_v40 = vsel %vm2010_vm1, nan, %v2020_v47  ;;  %v1568_v13 = vmul.f32 %v2640_v15, %v3826_v54 }
 0x28a   : > { %v1575_v29 = vrot.slane %v1574_v18, 4  ;;  %v2452_v24 = vmul.f32 %v2676_v8, %v1917_v17 }
 0x28b   : > { %v1577_v55 = vrot.slane %v1576_v35, 4  ;;  %v2453_v57 = vmul.f32 %v2677_v21, %v2021_v40 }
 0x28c   : > { %v2456_v11 = vmul.f32 %v2452_v24, %v1575_v29 }
 0x2de   : > { %v1294_v4 = vpop.f32.mrb[32].mxu0 }
 0x2df   : > { %v1295_v59 = vadd.f32 %v1294_v4, %v3824_v37  ;;  %v1365_v52 = vpop.f32.mrb[32].mxu1  ;;  %v1296_v6 = vpop.f32.mrb[33].mxu0  ;;  %v1584_v4 = vmul.f32 %v1575_v29, %v1568_v13 }
 0x2e0   : > { %v1366_v36 = vadd.f32 %v1365_v52, %v3824_v37  ;;  %v1297_v20 = vadd.f32 %v1296_v6, %v3824_v37  ;;  %v1367_v63 = vpop.f32.mrb[33].mxu1 }
 0x2e1   : > { %v1368_v9 = vadd.f32 %v1367_v63, %v3824_v37 }
 0x2e2   : > { %v1594_v1 = vcombine.low %v1295_v59, %v1297_v20  ;;  %v2457_v59 = vmul.f32 %v2453_v57, %v1577_v55 }
 0x2e3   : > { %v1595_v51 = vcombine.low %v1366_v36, %v1368_v9 }
 0x2e4   : > { %v1602_v44 = vmul.f32 %v1594_v1, %v1582_v53  ;;  %v1569_v53 = vmul.f32 %v2641_v43, %v1549_v50 }
 0x2e5   : > { %v1603_v2 = vmul.f32 %v1595_v51, %v1583_v58 }
 0x2e6   : > { %v2458_v5 = vadd.f32 %v2454_v31, %v1602_v44  ;;  %v1585_v33 = vmul.f32 %v1577_v55, %v1569_v53 }
 0x2e7   : > { %v2459_v12 = vadd.f32 %v2455_v61, %v1603_v2 }
 0x2e8   : > { %v2472_v28 = vrot.slane %v2458_v5, %v3815_v23 }
 0x2e9   : > { %v2479_v49 = vrot.slane %v2459_v12, %v3815_v23 }
 0x2eb   : > { %v2494_v22 = vcombine.low %v2472_v28, %v2479_v49 }
 0x2ef   : > { %v1436_v26 = vpop.f32.mrb[34].mxu0 }
 0x2f0   : > { %v1437_v32 = vadd.f32 %v1436_v26, %v3824_v37  ;;  %v1507_v30 = vpop.f32.mrb[34].mxu1  ;;  %v1438_v39 = vpop.f32.mrb[35].mxu0 }
 0x2f1   : > { %v1508_v31 = vadd.f32 %v1507_v30, %v3824_v37  ;;  %v1439_v58 = vadd.f32 %v1438_v39, %v3824_v37  ;;  %v1509_v16 = vpop.f32.mrb[35].mxu1 }
 0x2f2   : > { %v1510_v19 = vadd.f32 %v1509_v16, %v3824_v37  ;;  %v2502_v37 = vrot.slane %v2494_v22, %v3815_v23 }
 0x2f3   : > { %v1596_v54 = vcombine.low %v1437_v32, %v1439_v58 }
 0x2f4   : > { %v1597_v60 = vcombine.low %v1508_v31, %v1510_v19 }
 0x2f5   : > { %v1604_v52 = vmul.f32 %v1596_v54, %v1584_v4 }
 0x2f6   : > { %v1605_v6 = vmul.f32 %v1597_v60, %v1585_v33 }
 0x2f7   : > { %v2460_v42 = vadd.f32 %v2456_v11, %v1604_v52 }
 0x2f8   : > { %v2461_v46 = vadd.f32 %v2457_v59, %v1605_v6 }
 0x2f9   : > { %v2486_v62 = vrot.slane %v2460_v42, %v3815_v23 }
 0x2fa   : > { %v2493_v36 = vrot.slane %v2461_v46, %v3815_v23 }
 0x2fc   : > { %v2495_v20 = vcombine.low %v2486_v62, %v2493_v36 }
 0x2fe   : > { %v2509_v63 = vrot.slane %v2495_v20, %v3815_v23 }
 0x300   : > { %v2510_v9 = vcombine.low %v2502_v37, %v2509_v63 }
 0x302   : > { %2512 = vst [vmem:[%s327_s10] sm:$0xff] %v2510_v9 }
 0x303   : > { %2980 = shalt.err (!%p2977_p3)
}
 0x304   : > { %s2981_s18 = scalar_lea.hbm %s3865_s23, 128  ;;  %s2985_s30 = scalar_lea.hbm %s3916_s9, 256 }
 0x305   : > { %p2982_p4 = scmp.ne.s32.totalorder %s3865_s23, %s2981_s18  ;;  %p2986_p9 = scmp.lt.u32.totalorder %s3865_s23, %s3916_s9 }
 0x306   : > { %p2987_p10 = scmp.lt.u32.totalorder %s2985_s30, %s2981_s18  ;;  %p2989_p12 = scmp.lt.u32.totalorder %s2981_s18, %s3865_s23 }
 0x307   : > { %p2983_p7 = pnand %p2982_p4, %p3133_p5 }
 0x308   : > { %p2988_p11 = por %p2987_p10, %p2986_p9 }
 0x309   : > { %p2984_p8 = pneg %p2983_p7 }
 0x30a   : > { %p2990_p13 = por %p2989_p12, %p2988_p11 }
 0x30c   : > { %p2991_p0 = pnand %p2990_p13, %p2984_p8 }
 0x30e   : > { %2994 = shalt.err (!%p2991_p0)
}
 0x30f   : > { %2764 = dma.vmem_to_hbm [thread:$0]  (%p3133_p5), %s3867_s15, 128, %s3865_s23, %s2514_s24  }
 0x310 PF: > { %p2770_p1 = scmp.ge.s32.totalorder %s3029_s14, 2  ;;  %s2540_s22 = sand.u32 1, %s3017_s11  }
 0x311   : > { %s2541_s0 = scalar_lea.sflag [#allocation4], %s2540_s22 }
 0x312   : > { %p2767_p2 = pnand %p2770_p1, %p3137_p6 }
 0x314   : > { %3012 = dma.done.wait (!%p2767_p2), %s2541_s0, 128  }
 0x315   : > { %3014 = vsyncadd (!%p2767_p2), %s2541_s0, 4294967168  ;;  %p20_p3 = scmp.ge.s32.totalorder %s3120_s16, 4   ;;  %s3927_s11 = smov %s3021_s12 }
 0x316   : > { %s3928_s12 = smov %s3025_s13  ;;  %s3929_s13 = smov %s3131_s19 }
 0x317   : > { %s3930_s14 = smov %s3120_s16  ;;  %22 = sbr.rel (!%p20_p3) target bundleno = 5 (0x5), region = 91 }
 0x31e   :  { %2546 = vsyncpa [#allocation4], 1 }
 0x31f   :  { %2548 = vsyncpa [#allocation4 + $0x1], 1 }

</bundles_post_ra>
